<compile_context>
chip_gen: v5e
topology: v5e:2x2
jax: 0.10.0
libtpu: 0.0.40
codegen_flags: <defaults>
</compile_context>

<pallas_src>
import functools
import math

import jax
import jax.numpy as jnp
from jax import lax
from jax.experimental import pallas as pl
from jax.experimental.pallas import tpu as pltpu


# ----------------------------- helpers ---------------------------------------


def _cdiv(a, b):
    return -(-a // b)


def _round_up(a, b):
    return _cdiv(a, b) * b


# ----------------------------- kernels ---------------------------------------


def _conv_kernel(x_ref, halo_ref, w_ref, b_ref, o_ref, xfull_ref, acc_ref, *,
                 Ht, Wo, C4, Ct):
    """One (co, n, h) grid step of the space-to-depth-4 strided conv.

    x_ref:     (Ht,   Wo+1, 4C)  main rows of the s2d-4 input tile
    halo_ref:  (1,    Wo+1, 4C)  one halo row (first row of the next tile)
    w_ref:     (4, 4C, Ct)       per (i0, j0) window-shift weight matrices
    b_ref:     (1, Ct)           f32 bias slice
    o_ref:     (Ht, Wo, Ct)      output tile
    xfull_ref: (Ht+1, Wo+1, 4C)  VMEM scratch: main + halo rows
    acc_ref:   (Ht, Wo, Ct)      f32 VMEM accumulator
    """
    # Assemble the (Ht+1)-row window in VMEM (cheap, replaces the old HBM
    # materialization of overlapping tiles).
    xfull_ref[0:Ht] = x_ref[...]
    xfull_ref[Ht:Ht + 1] = halo_ref[...]

    acc_ref[...] = jnp.zeros_like(acc_ref)
    for i0 in range(2):
        # One full-width LHS per row shift, shared by both j0 shifts; the j0
        # slice is applied to the Ct-wide result instead of the 4C-wide input.
        lhs = xfull_ref[i0:i0 + Ht].reshape(Ht * (Wo + 1), C4)
        for j0 in range(2):
            p = jnp.dot(lhs, w_ref[2 * i0 + j0],
                        preferred_element_type=jnp.float32)
            acc_ref[...] += p.reshape(Ht, Wo + 1, Ct)[:, j0:j0 + Wo, :]

    o_ref[...] = (acc_ref[...] + b_ref[...]).astype(o_ref.dtype)


def _avgpool_kernel(x_ref, o_ref):
    # x_ref: (4, Ht, Wo, C) -> o_ref: (Ht, Wo, C)   (2x2 average pool, stride 2)
    s = (x_ref[0].astype(jnp.float32) + x_ref[1].astype(jnp.float32)
         + x_ref[2].astype(jnp.float32) + x_ref[3].astype(jnp.float32))
    o_ref[...] = (s * 0.25).astype(o_ref.dtype)


# ----------------------------- weight prep ------------------------------------


def _prepare_conv_weights(weight, bias):
    """(Cout,C,3,3), (Cout,) -> (w4 (4,4C,Cout_pad) f32, b (1,Cout_pad) f32, Cout)."""
    Cout, C, kh, kw = weight.shape
    assert (kh, kw) == (3, 3)
    Cout_pad = _round_up(Cout, 128)
    # weights -> 4 matrices (4C, Cout_pad); 3x3 zero-padded to 4x4 so every
    # (i0, j0) window shift contracts over all 4 s2d slots.
    w = jnp.transpose(weight, (2, 3, 1, 0)).astype(jnp.float32)      # (3,3,C,Co)
    w = jnp.pad(w, ((0, 1), (0, 1), (0, 0), (0, Cout_pad - Cout)))   # (4,4,C,Cp)
    w = w.reshape(2, 2, 2, 2, C, Cout_pad).transpose(0, 2, 1, 3, 4, 5)
    w4 = w.reshape(4, 4 * C, Cout_pad)            # [i0*2+j0, (a*2+b)*C+c, o]
    b = jnp.pad(bias.astype(jnp.float32),
                (0, Cout_pad - Cout)).reshape(1, Cout_pad)
    return w4, b, Cout


# ----------------------------- wrappers ---------------------------------------


def downsample_conv(x_nchw, weight=None, bias=None, padding=1, *, h_tile=None,
                    cout_tile=None, prepared=None):
    """Conv2d(C, Cout, 3, stride=2, padding=padding) on NCHW input."""
    N, C, H, W = x_nchw.shape
    if prepared is None:
        prepared = _prepare_conv_weights(weight, bias)
    w4_f32, b4, Cout = prepared
    C4 = 4 * C
    Cout_pad = w4_f32.shape[-1]
    assert w4_f32.shape == (4, C4, Cout_pad)

    Ho = (H + 2 * padding - 3) // 2 + 1
    Wo = (W + 2 * padding - 3) // 2 + 1

    x_isz = jnp.dtype(x_nchw.dtype).itemsize
    # MXU operands in the activation dtype (bf16 x -> bf16 weights: native MXU
    # rate + half the weight HBM/VMEM traffic); accumulation stays f32.
    w4 = w4_f32.astype(x_nchw.dtype)
    w_isz = jnp.dtype(w4.dtype).itemsize

    # Cout tiling: lane-dense stores; keep the (reused) weight tile VMEM-safe.
    if cout_tile is None:
        Ct = 256 if (Cout_pad % 256 == 0
                     and 2 * 4 * C4 * 256 * w_isz <= (20 << 20)) else 128
    else:
        Ct = cout_tile
    assert Cout_pad % Ct == 0 and Ct % 128 == 0
    n_co = Cout_pad // Ct
    w_tile_bytes = 4 * C4 * Ct * w_isz

    # H tiling: 1-row halo via a second BlockSpec (no duplicated HBM slabs);
    # non-divisible Ho is padded to the tile instead of collapsing to Ht=1.
    per_row = (2 * (Wo + 1) * C4 * x_isz          # main tile (double-buffered)
               + 2 * Wo * Ct * x_isz              # output tile (double-buffered)
               + Wo * Ct * 4                      # f32 accumulator scratch
               + (Wo + 1) * C4 * x_isz            # xfull scratch
               + 2 * (Wo + 1) * Ct * 4)           # lhs / matmul-result temps
    if h_tile is None:
        row_budget = max(4 << 20, (28 << 20) - 2 * w_tile_bytes)
        h_tile = row_budget // max(per_row, 1)
    Ht = max(1, min(int(h_tile), Ho))
    n_h = _cdiv(Ho, Ht)
    Ho_pad = n_h * Ht

    # pad + ONE transposing copy into the space-to-depth-4 layout:
    #   x4[n, i, j, (a*2+b)*C + c] = x_pad[n, c, 2i+a, 2j+b]
    Hp, Wp = 2 * (Ho_pad + 1), 2 * (Wo + 1)
    pad_b, pad_r = Hp - H - padding, Wp - W - padding
    assert pad_b >= 0 and pad_r >= 0
    xp = jnp.pad(x_nchw, ((0, 0), (0, 0), (padding, pad_b), (padding, pad_r)))
    x4 = xp.reshape(N, C, Ho_pad + 1, 2, Wo + 1, 2)
    x4 = x4.transpose(0, 2, 4, 3, 5, 1).reshape(N, Ho_pad + 1, Wo + 1, C4)

    # Generation-aware scoped-VMEM limit from the real working set.
    est = (2 * (Ht * (Wo + 1) * C4 * x_isz)            # main tile x2
           + 2 * ((Wo + 1) * C4 * x_isz)               # halo row x2
           + 2 * w_tile_bytes                          # weight tile x2
           + 2 * (Ht * Wo * Ct * x_isz)                # out tile x2
           + (Ht + 1) * (Wo + 1) * C4 * x_isz          # xfull scratch
           + Ht * Wo * Ct * 4                          # acc scratch
           + Ht * (Wo + 1) * C4 * x_isz                # lhs temp
           + Ht * (Wo + 1) * Ct * 4                    # matmul-result temp
           + 2 * Ct * 4)                               # bias x2
    try:
        vmem_cap = pltpu.get_tpu_info().vmem_capacity_bytes
    except Exception:
        vmem_cap = 64 << 20                            # v7x floor
    vmem_limit = int(min(max(est + (8 << 20), 32 << 20), vmem_cap - (4 << 20)))

    kernel = functools.partial(_conv_kernel, Ht=Ht, Wo=Wo, C4=C4, Ct=Ct)
    out = pl.pallas_call(
        kernel,
        out_shape=jax.ShapeDtypeStruct((N, Ho_pad, Wo, Cout_pad), x_nchw.dtype),
        grid_spec=pltpu.PrefetchScalarGridSpec(
            num_scalar_prefetch=0,
            # co OUTERMOST: the weight slab index only changes on the outer
            # axis, so each (4,4C,Ct) weight tile is DMA'd exactly once.
            grid=(n_co, N, n_h),
            in_specs=[
                pl.BlockSpec((None, Ht, Wo + 1, C4),
                             lambda co, n, h: (n, h, 0, 0)),
                # 1-row halo: block size 1 along H -> block index == row index
                pl.BlockSpec((None, 1, Wo + 1, C4),
                             lambda co, n, h: (n, (h + 1) * Ht, 0, 0)),
                pl.BlockSpec((4, C4, Ct), lambda co, n, h: (0, 0, co)),
                pl.BlockSpec((1, Ct), lambda co, n, h: (0, co)),
            ],
            out_specs=pl.BlockSpec((None, Ht, Wo, Ct),
                                   lambda co, n, h: (n, h, 0, co)),
            scratch_shapes=[
                pltpu.VMEM((Ht + 1, Wo + 1, C4), x_nchw.dtype),
                pltpu.VMEM((Ht, Wo, Ct), jnp.float32),
            ],
        ),
        compiler_params=pltpu.CompilerParams(
            dimension_semantics=("parallel", "parallel", "parallel"),
            vmem_limit_bytes=vmem_limit),
    )(x4, x4, w4, b4)

    if Ho_pad != Ho or Cout_pad != Cout:
        out = out[:, :Ho, :, :Cout]
    # TODO(synk): expose an NHWC-in/NHWC-out variant (skip both layout
    # transposes) for channels-last callers; fold N into the matmul M dim for
    # tiny-spatial deep layers.
    return jnp.transpose(out, (0, 3, 1, 2))          # back to NCHW


def downsample_avgpool(x_nchw, *, h_tile=None):
    """AvgPool2d(kernel_size=2, stride=2) on NCHW input (floors odd H/W)."""
    N, C, H, W = x_nchw.shape
    Ho, Wo = H // 2, W // 2
    x = x_nchw
    if H != 2 * Ho or W != 2 * Wo:
        x = x[:, :, :2 * Ho, :2 * Wo]
    isz = jnp.dtype(x.dtype).itemsize

    per_row = 2 * 4 * Wo * C * isz + 2 * Wo * C * isz
    if h_tile is None:
        h_tile = (16 << 20) // max(per_row, 1)
    Ht = max(1, min(int(h_tile), Ho))
    n_h = _cdiv(Ho, Ht)
    Ho_pad = n_h * Ht

    # single transposing copy NCHW -> (N,4,Ho,Wo,C); slot a*2+b = x[2i+a, 2j+b]
    # TODO(synk): do the 2x2 reduction in-kernel straight from the NCHW layout
    # (sublane-pair add + lane-pair select) to drop this extra HBM pass.
    x4 = x.reshape(N, C, Ho, 2, Wo, 2).transpose(0, 3, 5, 2, 4, 1)
    x4 = x4.reshape(N, 4, Ho, Wo, C)
    if Ho_pad != Ho:
        x4 = jnp.pad(x4, ((0, 0), (0, 0), (0, Ho_pad - Ho), (0, 0), (0, 0)))

    out = pl.pallas_call(
        _avgpool_kernel,
        out_shape=jax.ShapeDtypeStruct((N, Ho_pad, Wo, C), x.dtype),
        grid_spec=pltpu.PrefetchScalarGridSpec(
            num_scalar_prefetch=0,
            grid=(N, n_h),
            in_specs=[pl.BlockSpec((None, 4, Ht, Wo, C),
                                   lambda n, h: (n, 0, h, 0, 0))],
            out_specs=pl.BlockSpec((None, Ht, Wo, C),
                                   lambda n, h: (n, h, 0, 0)),
        ),
        compiler_params=pltpu.CompilerParams(
            dimension_semantics=("parallel", "parallel")),
    )(x4)
    if Ho_pad != Ho:
        out = out[:, :Ho]
    return jnp.transpose(out, (0, 3, 1, 2))


class Downsample:
    """JAX/Pallas port of openaimodel.Downsample (dims=2)."""

    def __init__(self, channels, use_conv, dims=2, out_channels=None,
                 padding=1, key=None):
        assert dims == 2  # TODO(synk): 1D / 3D conv and avg_pool variants not implemented
        self.channels = channels
        self.out_channels = out_channels or channels
        self.use_conv = use_conv
        self.padding = padding
        if use_conv:
            key = jax.random.PRNGKey(0) if key is None else key
            kw_key, kb_key = jax.random.split(key)
            fan_in = channels * 3 * 3
            bound = 1.0 / math.sqrt(fan_in)      # PyTorch Conv2d default init
            self.weight = jax.random.uniform(
                kw_key, (self.out_channels, channels, 3, 3),
                jnp.float32, -bound, bound)
            self.bias = jax.random.uniform(
                kb_key, (self.out_channels,), jnp.float32, -bound, bound)
            # Weight refactor (transpose/pad/reshape into the 4 matmul
            # matrices) is done ONCE here and reused on every call.
            self._prepared = _prepare_conv_weights(self.weight, self.bias)
        else:
            assert self.channels == self.out_channels

    def __call__(self, x):
        assert x.shape[1] == self.channels
        if self.use_conv:
            return downsample_conv(x, padding=self.padding,
                                   prepared=self._prepared)
        return downsample_avgpool(x)


# ------------------------------- main -----------------------------------------

if __name__ == "__main__":
    key = jax.random.PRNGKey(0)
    kx, kp, kx2, kp2 = jax.random.split(key, 4)
    N, C, H, W = 2, 4, 16, 16
    x = jax.random.normal(kx, (N, C, H, W), jnp.float32)

    # --- use_conv=True path ---------------------------------------------------
    ds_conv = Downsample(channels=C, use_conv=True, dims=2,
                         out_channels=C, padding=1, key=kp)
    y_conv = jax.block_until_ready(ds_conv(x))
    assert y_conv.shape == (N, C, H // 2, W // 2)

    ref_conv = lax.conv_general_dilated(
        x, ds_conv.weight, window_strides=(2, 2), padding=[(1, 1), (1, 1)],
        dimension_numbers=("NCHW", "OIHW", "NCHW"),
    ) + ds_conv.bias[None, :, None, None]
    assert jnp.allclose(y_conv, ref_conv, atol=1e-4, rtol=1e-4)

    # same conv, forced H tiling (exercises the halo-row BlockSpec, n_h = 2)
    y_conv_t = jax.block_until_ready(
        downsample_conv(x, ds_conv.weight, ds_conv.bias, padding=1, h_tile=4))
    assert jnp.allclose(y_conv_t, ref_conv, atol=1e-4, rtol=1e-4)

    # bf16 activations: weights are cast to bf16 inside the wrapper (native
    # MXU operands), accumulation stays f32.
    xb = x.astype(jnp.bfloat16)
    yb = jax.block_until_ready(ds_conv(xb))
    assert yb.shape == (N, C, H // 2, W // 2) and yb.dtype == jnp.bfloat16
    ref_b = lax.conv_general_dilated(
        xb, ds_conv.weight.astype(jnp.bfloat16), window_strides=(2, 2),
        padding=[(1, 1), (1, 1)], dimension_numbers=("NCHW", "OIHW", "NCHW"),
        preferred_element_type=jnp.float32,
    ) + ds_conv.bias[None, :, None, None]
    assert jnp.allclose(yb.astype(jnp.float32), ref_b, atol=1e-1, rtol=1e-1)

    # conv with a larger Cout (320 -> padded 384, Ct=128, n_co=3: weight tile
    # is reused across the inner (n, h) axes because co is outermost)
    Cout2 = 320
    ds_conv2 = Downsample(channels=C, use_conv=True, dims=2,
                          out_channels=Cout2, padding=1, key=kp2)
    x2 = jax.random.normal(kx2, (1, C, 8, 8), jnp.float32)
    y2 = jax.block_until_ready(ds_conv2(x2))
    assert y2.shape == (1, Cout2, 4, 4)
    ref2 = lax.conv_general_dilated(
        x2, ds_conv2.weight, window_strides=(2, 2), padding=[(1, 1), (1, 1)],
        dimension_numbers=("NCHW", "OIHW", "NCHW"),
    ) + ds_conv2.bias[None, :, None, None]
    assert jnp.allclose(y2, ref2, atol=1e-4, rtol=1e-4)

    # --- use_conv=False path (avg pool) ----------------------------------------
    ds_pool = Downsample(channels=C, use_conv=False, dims=2)
    y_pool = jax.block_until_ready(ds_pool(x))
    assert y_pool.shape == (N, C, H // 2, W // 2)

    ref_pool = x.reshape(N, C, H // 2, 2, W // 2, 2).mean(axis=(3, 5))
    assert jnp.allclose(y_pool, ref_pool, atol=1e-5, rtol=1e-5)

    y_pool_t = jax.block_until_ready(downsample_avgpool(x, h_tile=4))
    assert jnp.allclose(y_pool_t, ref_pool, atol=1e-5, rtol=1e-5)

    print("KERNEL_OK")
</pallas_src>

<mosaic_0001>
module attributes {stable_mosaic.version = 11 : i64} {
  func.func @_conv_kernel(%arg0: i32, %arg1: i32, %arg2: i32, %arg3: memref<1x8x9x16xf32, #tpu.memory_space<vmem>>, %arg4: memref<1x1x9x16xf32, #tpu.memory_space<vmem>>, %arg5: memref<4x16x128xf32, #tpu.memory_space<vmem>>, %arg6: memref<1x128xf32, #tpu.memory_space<vmem>>, %arg7: memref<1x8x8x128xf32, #tpu.memory_space<vmem>>, %arg8: memref<9x9x16xf32, #tpu.memory_space<vmem>>, %arg9: memref<8x8x128xf32, #tpu.memory_space<vmem>>) attributes {dimension_semantics = [#tpu.dimension_semantics<parallel>, #tpu.dimension_semantics<parallel>, #tpu.dimension_semantics<parallel>], iteration_bounds = array<i64: 1, 2, 1>, scalar_prefetch = 0 : i64, scratch_operands = 2 : i64, tpu.core_type = #tpu.core_type<tc>, window_params = [{transform_indices = @transform_0, window_bounds = array<i64: 1, 8, 9, 16>}, {transform_indices = @transform_1, window_bounds = array<i64: 1, 1, 9, 16>}, {transform_indices = @transform_2, window_bounds = array<i64: 4, 16, 128>}, {transform_indices = @transform_3, window_bounds = array<i64: 1, 128>}, {transform_indices = @transform_4, window_bounds = array<i64: 1, 8, 8, 128>}]} {
    %c0 = arith.constant 0 : index
    %c0_0 = arith.constant 0 : index
    %c0_1 = arith.constant 0 : index
    %c0_2 = arith.constant 0 : index
    %0 = vector.load %arg3[%c0, %c0_0, %c0_1, %c0_2] : memref<1x8x9x16xf32, #tpu.memory_space<vmem>>, vector<1x8x9x16xf32>
    %1 = vector.shape_cast %0 : vector<1x8x9x16xf32> to vector<8x9x16xf32>
    %c0_3 = arith.constant 0 : index
    %c0_4 = arith.constant 0 : index
    %c0_5 = arith.constant 0 : index
    %2 = vector.load %arg8[%c0_3, %c0_4, %c0_5] : memref<9x9x16xf32, #tpu.memory_space<vmem>>, vector<8x9x16xf32>
    tpu.vector_store %arg8[%c0_3, %c0_4, %c0_5], %1 {strides = array<i32>} : memref<9x9x16xf32, #tpu.memory_space<vmem>>, vector<8x9x16xf32>,
    %c0_6 = arith.constant 0 : index
    %c0_7 = arith.constant 0 : index
    %c0_8 = arith.constant 0 : index
    %c0_9 = arith.constant 0 : index
    %3 = vector.load %arg4[%c0_6, %c0_7, %c0_8, %c0_9] : memref<1x1x9x16xf32, #tpu.memory_space<vmem>>, vector<1x1x9x16xf32>
    %4 = vector.shape_cast %3 : vector<1x1x9x16xf32> to vector<1x9x16xf32>
    %c8 = arith.constant 8 : index
    %c0_10 = arith.constant 0 : index
    %c0_11 = arith.constant 0 : index
    %5 = vector.load %arg8[%c8, %c0_10, %c0_11] : memref<9x9x16xf32, #tpu.memory_space<vmem>>, vector<1x9x16xf32>
    tpu.vector_store %arg8[%c8, %c0_10, %c0_11], %4 {strides = array<i32>} : memref<9x9x16xf32, #tpu.memory_space<vmem>>, vector<1x9x16xf32>,
    %cst = arith.constant 0.000000e+00 : f32
    %6 = vector.broadcast %cst : f32 to vector<8x8x128xf32>
    %c0_12 = arith.constant 0 : index
    %c0_13 = arith.constant 0 : index
    %c0_14 = arith.constant 0 : index
    %7 = vector.load %arg9[%c0_12, %c0_13, %c0_14] : memref<8x8x128xf32, #tpu.memory_space<vmem>>, vector<8x8x128xf32>
    tpu.vector_store %arg9[%c0_12, %c0_13, %c0_14], %6 {strides = array<i32>} : memref<8x8x128xf32, #tpu.memory_space<vmem>>, vector<8x8x128xf32>,
    %c0_15 = arith.constant 0 : index
    %c0_16 = arith.constant 0 : index
    %c0_17 = arith.constant 0 : index
    %8 = vector.load %arg8[%c0_15, %c0_16, %c0_17] : memref<9x9x16xf32, #tpu.memory_space<vmem>>, vector<8x9x16xf32>
    %9 = vector.shape_cast %8 : vector<8x9x16xf32> to vector<72x16xf32>
    %c0_18 = arith.constant 0 : index
    %c0_19 = arith.constant 0 : index
    %c0_20 = arith.constant 0 : index
    %10 = vector.load %arg5[%c0_18, %c0_19, %c0_20] : memref<4x16x128xf32, #tpu.memory_space<vmem>>, vector<1x16x128xf32>
    %11 = vector.shape_cast %10 : vector<1x16x128xf32> to vector<16x128xf32>
    %cst_21 = arith.constant dense<0.000000e+00> : vector<72x128xf32>
    %12 = tpu.matmul %9, %11, %cst_21 {dimension_numbers = #tpu.dot_dimension_numbers<[1], [0], [0], [1], [0, 0, 1, 1], [], []>} : vector<72x16xf32>, vector<16x128xf32>, vector<72x128xf32> -> vector<72x128xf32>
    %c0_22 = arith.constant 0 : index
    %c0_23 = arith.constant 0 : index
    %c0_24 = arith.constant 0 : index
    %13 = vector.load %arg9[%c0_22, %c0_23, %c0_24] : memref<8x8x128xf32, #tpu.memory_space<vmem>>, vector<8x8x128xf32>
    %14 = vector.shape_cast %12 : vector<72x128xf32> to vector<8x9x128xf32>
    %15 = vector.extract_strided_slice %14 {offsets = [0, 0, 0], sizes = [8, 8, 128], strides = [1, 1, 1]} : vector<8x9x128xf32> to vector<8x8x128xf32>
    %16 = arith.addf %13, %15 : vector<8x8x128xf32>
    %c0_25 = arith.constant 0 : index
    %c0_26 = arith.constant 0 : index
    %c0_27 = arith.constant 0 : index
    %17 = vector.load %arg9[%c0_25, %c0_26, %c0_27] : memref<8x8x128xf32, #tpu.memory_space<vmem>>, vector<8x8x128xf32>
    tpu.vector_store %arg9[%c0_25, %c0_26, %c0_27], %16 {strides = array<i32>} : memref<8x8x128xf32, #tpu.memory_space<vmem>>, vector<8x8x128xf32>,
    %c1 = arith.constant 1 : index
    %c0_28 = arith.constant 0 : index
    %c0_29 = arith.constant 0 : index
    %18 = vector.load %arg5[%c1, %c0_28, %c0_29] : memref<4x16x128xf32, #tpu.memory_space<vmem>>, vector<1x16x128xf32>
    %19 = vector.shape_cast %18 : vector<1x16x128xf32> to vector<16x128xf32>
    %cst_30 = arith.constant dense<0.000000e+00> : vector<72x128xf32>
    %20 = tpu.matmul %9, %19, %cst_30 {dimension_numbers = #tpu.dot_dimension_numbers<[1], [0], [0], [1], [0, 0, 1, 1], [], []>} : vector<72x16xf32>, vector<16x128xf32>, vector<72x128xf32> -> vector<72x128xf32>
    %c0_31 = arith.constant 0 : index
    %c0_32 = arith.constant 0 : index
    %c0_33 = arith.constant 0 : index
    %21 = vector.load %arg9[%c0_31, %c0_32, %c0_33] : memref<8x8x128xf32, #tpu.memory_space<vmem>>, vector<8x8x128xf32>
    %22 = vector.shape_cast %20 : vector<72x128xf32> to vector<8x9x128xf32>
    %23 = vector.extract_strided_slice %22 {offsets = [0, 1, 0], sizes = [8, 8, 128], strides = [1, 1, 1]} : vector<8x9x128xf32> to vector<8x8x128xf32>
    %24 = arith.addf %21, %23 : vector<8x8x128xf32>
    %c0_34 = arith.constant 0 : index
    %c0_35 = arith.constant 0 : index
    %c0_36 = arith.constant 0 : index
    %25 = vector.load %arg9[%c0_34, %c0_35, %c0_36] : memref<8x8x128xf32, #tpu.memory_space<vmem>>, vector<8x8x128xf32>
    tpu.vector_store %arg9[%c0_34, %c0_35, %c0_36], %24 {strides = array<i32>} : memref<8x8x128xf32, #tpu.memory_space<vmem>>, vector<8x8x128xf32>,
    %c1_37 = arith.constant 1 : index
    %c0_38 = arith.constant 0 : index
    %c0_39 = arith.constant 0 : index
    %26 = vector.load %arg8[%c1_37, %c0_38, %c0_39] : memref<9x9x16xf32, #tpu.memory_space<vmem>>, vector<8x9x16xf32>
    %27 = vector.shape_cast %26 : vector<8x9x16xf32> to vector<72x16xf32>
    %c2 = arith.constant 2 : index
    %c0_40 = arith.constant 0 : index
    %c0_41 = arith.constant 0 : index
    %28 = vector.load %arg5[%c2, %c0_40, %c0_41] : memref<4x16x128xf32, #tpu.memory_space<vmem>>, vector<1x16x128xf32>
    %29 = vector.shape_cast %28 : vector<1x16x128xf32> to vector<16x128xf32>
    %cst_42 = arith.constant dense<0.000000e+00> : vector<72x128xf32>
    %30 = tpu.matmul %27, %29, %cst_42 {dimension_numbers = #tpu.dot_dimension_numbers<[1], [0], [0], [1], [0, 0, 1, 1], [], []>} : vector<72x16xf32>, vector<16x128xf32>, vector<72x128xf32> -> vector<72x128xf32>
    %c0_43 = arith.constant 0 : index
    %c0_44 = arith.constant 0 : index
    %c0_45 = arith.constant 0 : index
    %31 = vector.load %arg9[%c0_43, %c0_44, %c0_45] : memref<8x8x128xf32, #tpu.memory_space<vmem>>, vector<8x8x128xf32>
    %32 = vector.shape_cast %30 : vector<72x128xf32> to vector<8x9x128xf32>
    %33 = vector.extract_strided_slice %32 {offsets = [0, 0, 0], sizes = [8, 8, 128], strides = [1, 1, 1]} : vector<8x9x128xf32> to vector<8x8x128xf32>
    %34 = arith.addf %31, %33 : vector<8x8x128xf32>
    %c0_46 = arith.constant 0 : index
    %c0_47 = arith.constant 0 : index
    %c0_48 = arith.constant 0 : index
    %35 = vector.load %arg9[%c0_46, %c0_47, %c0_48] : memref<8x8x128xf32, #tpu.memory_space<vmem>>, vector<8x8x128xf32>
    tpu.vector_store %arg9[%c0_46, %c0_47, %c0_48], %34 {strides = array<i32>} : memref<8x8x128xf32, #tpu.memory_space<vmem>>, vector<8x8x128xf32>,
    %c3 = arith.constant 3 : index
    %c0_49 = arith.constant 0 : index
    %c0_50 = arith.constant 0 : index
    %36 = vector.load %arg5[%c3, %c0_49, %c0_50] : memref<4x16x128xf32, #tpu.memory_space<vmem>>, vector<1x16x128xf32>
    %37 = vector.shape_cast %36 : vector<1x16x128xf32> to vector<16x128xf32>
    %cst_51 = arith.constant dense<0.000000e+00> : vector<72x128xf32>
    %38 = tpu.matmul %27, %37, %cst_51 {dimension_numbers = #tpu.dot_dimension_numbers<[1], [0], [0], [1], [0, 0, 1, 1], [], []>} : vector<72x16xf32>, vector<16x128xf32>, vector<72x128xf32> -> vector<72x128xf32>
    %c0_52 = arith.constant 0 : index
    %c0_53 = arith.constant 0 : index
    %c0_54 = arith.constant 0 : index
    %39 = vector.load %arg9[%c0_52, %c0_53, %c0_54] : memref<8x8x128xf32, #tpu.memory_space<vmem>>, vector<8x8x128xf32>
    %40 = vector.shape_cast %38 : vector<72x128xf32> to vector<8x9x128xf32>
    %41 = vector.extract_strided_slice %40 {offsets = [0, 1, 0], sizes = [8, 8, 128], strides = [1, 1, 1]} : vector<8x9x128xf32> to vector<8x8x128xf32>
    %42 = arith.addf %39, %41 : vector<8x8x128xf32>
    %c0_55 = arith.constant 0 : index
    %c0_56 = arith.constant 0 : index
    %c0_57 = arith.constant 0 : index
    %43 = vector.load %arg9[%c0_55, %c0_56, %c0_57] : memref<8x8x128xf32, #tpu.memory_space<vmem>>, vector<8x8x128xf32>
    tpu.vector_store %arg9[%c0_55, %c0_56, %c0_57], %42 {strides = array<i32>} : memref<8x8x128xf32, #tpu.memory_space<vmem>>, vector<8x8x128xf32>,
    %c0_58 = arith.constant 0 : index
    %c0_59 = arith.constant 0 : index
    %c0_60 = arith.constant 0 : index
    %44 = vector.load %arg9[%c0_58, %c0_59, %c0_60] : memref<8x8x128xf32, #tpu.memory_space<vmem>>, vector<8x8x128xf32>
    %c0_61 = arith.constant 0 : index
    %c0_62 = arith.constant 0 : index
    %45 = vector.load %arg6[%c0_61, %c0_62] : memref<1x128xf32, #tpu.memory_space<vmem>>, vector<1x128xf32>
    %46 = vector.shape_cast %45 : vector<1x128xf32> to vector<1x1x128xf32>
    %47 = vector.broadcast %46 : vector<1x1x128xf32> to vector<8x8x128xf32>
    %48 = arith.addf %44, %47 : vector<8x8x128xf32>
    %c0_63 = arith.constant 0 : index
    %c0_64 = arith.constant 0 : index
    %c0_65 = arith.constant 0 : index
    %c0_66 = arith.constant 0 : index
    %49 = vector.load %arg7[%c0_63, %c0_64, %c0_65, %c0_66] : memref<1x8x8x128xf32, #tpu.memory_space<vmem>>, vector<1x8x8x128xf32>
    %50 = vector.shape_cast %49 : vector<1x8x8x128xf32> to vector<8x8x128xf32>
    %51 = vector.shape_cast %48 : vector<8x8x128xf32> to vector<1x8x8x128xf32>
    tpu.vector_store %arg7[%c0_63, %c0_64, %c0_65, %c0_66], %51 {strides = array<i32>} : memref<1x8x8x128xf32, #tpu.memory_space<vmem>>, vector<1x8x8x128xf32>,
    return
  }
  func.func @transform_0(%arg0: i32, %arg1: i32, %arg2: i32) -> (i32, i32, i32, i32) {
    %c0_i32 = arith.constant 0 : i32
    %c0_i32_0 = arith.constant 0 : i32
    %c0_i32_1 = arith.constant 0 : i32
    return %arg1, %arg2, %c0_i32, %c0_i32_0 : i32, i32, i32, i32
  }
  func.func @transform_1(%arg0: i32, %arg1: i32, %arg2: i32) -> (i32, i32, i32, i32) {
    %c1_i32 = arith.constant 1 : i32
    %0 = arith.addi %arg2, %c1_i32 : i32
    %c8_i32 = arith.constant 8 : i32
    %1 = arith.muli %0, %c8_i32 : i32
    %c0_i32 = arith.constant 0 : i32
    %c0_i32_0 = arith.constant 0 : i32
    %c0_i32_1 = arith.constant 0 : i32
    return %arg1, %1, %c0_i32, %c0_i32_0 : i32, i32, i32, i32
  }
  func.func @transform_2(%arg0: i32, %arg1: i32, %arg2: i32) -> (i32, i32, i32) {
    %c0_i32 = arith.constant 0 : i32
    %c0_i32_0 = arith.constant 0 : i32
    %c0_i32_1 = arith.constant 0 : i32
    return %c0_i32, %c0_i32_0, %arg0 : i32, i32, i32
  }
  func.func @transform_3(%arg0: i32, %arg1: i32, %arg2: i32) -> (i32, i32) {
    %c0_i32 = arith.constant 0 : i32
    %c0_i32_0 = arith.constant 0 : i32
    return %c0_i32, %arg0 : i32, i32
  }
  func.func @transform_4(%arg0: i32, %arg1: i32, %arg2: i32) -> (i32, i32, i32, i32) {
    %c0_i32 = arith.constant 0 : i32
    %c0_i32_0 = arith.constant 0 : i32
    return %arg1, %arg2, %c0_i32, %arg0 : i32, i32, i32, i32
  }
}

</mosaic_0001>

<bundles_post_ra>
// kernel: tpu_custom_call.1
= control target key start
LH: loop header
LB: loop body
LE: loop exit
PB: predicated region body
PF: predicated region fallthrough
CT: control target
= control target key end

     0   :  { %9 = vsyncpa [#allocation5], 0  ;;  %s3167_s0 = inlined_call_operand.vmem [shape: f32[2,9,9,16], index: 0, kind: input, shape index: {}]   ;;  %s3168_s1 = inlined_call_operand.vmem [shape: f32[2,9,9,16], index: 1, kind: input, shape index: {}]   ;;  %s3169_s2 = inlined_call_operand.vmem [shape: f32[4,16,128], index: 2, kind: input, shape index: {}]   ;;  %s3170_s3 = inlined_call_operand.vmem [shape: f32[1,128], index: 3, kind: input, shape index: {}]   ;;  %s3171_s4 = inlined_call_operand.hbm [shape: f32[2,8,8,128], index: 4, kind: output, shape index: {}]  }
   0x1   :  { %11 = vsyncpa [#allocation5 + $0x1], 0  ;;  %s2291_s15 = smov 0   ;;  %s2293_s16 = smov 0  }
   0x2   :  { %s2295_s17 = smov 0   ;;  %s2297_s18 = smov 0  }
   0x3   :  { %s2299_s19 = smov 0   ;;  %s2301_s20 = smov 0  }
   0x4 LB: > { %s2063_s21 = sadd.s32 4294967295, %s2262_s20   ;;  %s2064_s22 = sadd.s32 4294967294, %s2262_s20   ;;  %s2262_s20 = sphi %s2301_s20, %s17_s20   ;;  %s2258_s19 = sphi %s2299_s19, %s3325_s19   ;;  %s2254_s18 = sphi %s2297_s18, %s3324_s18   ;;  %s2250_s17 = sphi %s2295_s17, %s3323_s17   ;;  %s2246_s16 = sphi %s2293_s16, %s3322_s16   ;;  %s2242_s15 = sphi %s2291_s15, %s3321_s15  }
   0x5   : > { %s32_s23 = sadd.s32 1, %s2258_s19  ;;  %s159_s24 = sadd.s32 1, %s2250_s17 }
   0x6   : > { %p34_p0 = scmp.ge.s32.totalorder %s32_s23, 2  ;;  %p169_p1 = scmp.ne.s32.totalorder %s2250_s17, %s2246_s16 }
   0x7   : > { %p170_p2 = scmp.eq.s32.totalorder %s2063_s21, 1  ;;  %p175_p3 = scmp.ne.s32.totalorder %s2246_s16, %s2242_s15 }
   0x8   : > { %s3327_s23 = smov (%p34_p0, %s32_s23), 0  ;;  %p176_p5 = scmp.eq.s32.totalorder %s2064_s22, 1 }
   0x9   : > { %p2331_p4 = por %p170_p2, %p169_p1  ;;  %s152_s26 = ssub.s32 %s2258_s19, %s3327_s23 }
   0xa   : > { %p2069_p6 = scmp.ge.s32.totalorder %s2262_s20, 1  ;;  %p157_p7 = scmp.eq.s32.totalorder %s152_s26, 0 }
   0xb   : > { %p2338_p8 = por %p176_p5, %p175_p3  ;;  %p247_p9 = scmp.lt.s32.totalorder %s2262_s20, 3 }
   0xc   : > { %s2344_s28 = scalar_select %p157_p7, %s2250_s17, %s159_s24  }
   0xd   : > { %p248_p10 = pnand %p2069_p6, %p247_p9 }
   0xf   : > { %251 = sbr.rel (%p248_p10) target bundleno = 1173 (0x495), region = 36 }
  0x14   : > { %v479_v0 = vld [vmem:[%s3169_s2 + $0x8] sm:$0xff]  ;;  %v478_v1 = vld [vmem:[%s3169_s2] sm:$0xff]  ;;  %p307_p11 = scmp.lt.s32.totalorder %s2254_s18, 1  ;;  %vm359_vm0 = vcmask 130048   ;;  %vm361_vm1 = vcmask 122880   ;;  %s298_s12 = sand.u32 1, %s2246_s16  }
  0x15   : > { %600 = vmatpush.msra.mxu0 %v479_v0  ;;  %s2070_s21 = sshll.u32 %s298_s12, 6  ;;  %s2122_s24 = sshll.u32 %s2254_s18, 6 }
  0x16   : > { %s2354_s7 = scalar_select %p307_p11, %s2254_s18, 1 }
  0x17   : > { %601 = vmatpush.msra.mxu0 %v478_v1  ;;  %s1925_s30 = scalar_lea.hbm %s3171_s4, %s2122_s24  ;;  %s1911_s18 = scalar_lea.sflag [#allocation5], %s298_s12 }
  0x18   : > { %s2123_s8 = smul.u32 144, %s2354_s7  ;;  %s1928_s6 = sshll.u32 %s1925_s30, 4  ;;  %s1929_s6 = int_to_ptr.hbm [resolvable:$true] %s1928_s6 }
  0x19   : > { %s2198_s7 = sshra.s32 %s1929_s6, 4  ;;  %s2199_s7 = int_to_ptr.hbm [resolvable:$true] %s2198_s7 }
  0x1a   : > { %s2362_s11 = scalar_lea.vmem %s3167_s0, %s2123_s8  ;;  %s2121_s22 = sadd.s32 128, %s2123_s8 }
  0x1b   : > { %v343_v2 = vld [vmem:[%s2362_s11] sm:$0xff]  ;;  %v344_v3 = vld [vmem:[%s2362_s11 + $0x8] sm:$0x1]  ;;  %v345_v4 = vld [vmem:[%s2362_s11 + $0x10] sm:$0xff]  ;;  %s332_s29 = scalar_lea.vmem %s3168_s1, %s2121_s22  ;;  %s3093_s22 = scalar_lea.vmem [#allocation4], %s2070_s21 }
  0x1c   : > { %360 = vst.msk [vmem:[#allocation2] sm:$0xff] %vm359_vm0, %v343_v2  ;;  %v346_v5 = vld [vmem:[%s2362_s11 + $0x18] sm:$0x1]  ;;  %v347_v6 = vld [vmem:[%s2362_s11 + $0x20] sm:$0xff]  ;;  %v348_v15 = vld [vmem:[%s2362_s11 + $0x28] sm:$0x1]  ;;  %p2205_p1 = scmp.lt.s32.totalorder %s2199_s7, %s3171_s4 }
  0x1d   : > { %362 = vst.msk [vmem:[#allocation2 + $0x8] sm:$0x1] %vm361_vm1, %v344_v3  ;;  %v349_v16 = vld [vmem:[%s2362_s11 + $0x30] sm:$0xff]  ;;  %v350_v26 = vld [vmem:[%s2362_s11 + $0x38] sm:$0x1]  ;;  %v351_v27 = vld [vmem:[%s2362_s11 + $0x40] sm:$0xff] }
  0x1e   : > { %363 = vst.msk [vmem:[#allocation2 + $0x10] sm:$0xff] %vm359_vm0, %v345_v4  ;;  %v352_v37 = vld [vmem:[%s2362_s11 + $0x48] sm:$0x1]  ;;  %v353_v38 = vld [vmem:[%s2362_s11 + $0x50] sm:$0xff]  ;;  %v354_v48 = vld [vmem:[%s2362_s11 + $0x58] sm:$0x1] }
  0x1f   : > { %364 = vst.msk [vmem:[#allocation2 + $0x18] sm:$0x1] %vm361_vm1, %v346_v5  ;;  %v355_v49 = vld [vmem:[%s2362_s11 + $0x60] sm:$0xff]  ;;  %v356_v59 = vld [vmem:[%s2362_s11 + $0x68] sm:$0x1]  ;;  %v357_v60 = vld [vmem:[%s2362_s11 + $0x70] sm:$0xff] }
  0x20   : > { %365 = vst.msk [vmem:[#allocation2 + $0x20] sm:$0xff] %vm359_vm0, %v347_v6  ;;  %v358_v6 = vld [vmem:[%s2362_s11 + $0x78] sm:$0x1]  ;;  %s1926_s5 = sshll.u32 %s3093_s22, 4  ;;  %s2200_s8 = scalar_lea.hbm %s2199_s7, 64  ;;  %s1927_s5 = int_to_ptr.vmem [resolvable:$true] %s1926_s5 }
  0x21   : > { %366 = vst.msk [vmem:[#allocation2 + $0x28] sm:$0x1] %vm361_vm1, %v348_v15  ;;  %p2201_p12 = scmp.ne.s32.totalorder %s2199_s7, %s2200_s8  ;;  %s2204_s11 = scalar_lea.hbm %s3171_s4, 128 }
  0x22   : > { %367 = vst.msk [vmem:[#allocation2 + $0x30] sm:$0xff] %vm359_vm0, %v349_v16  ;;  %p2206_p2 = scmp.lt.s32.totalorder %s2204_s11, %s2200_s8 }
  0x23   : > { %v2374_v7 = vld [vmem:[#allocation2] sm:$0xff]  ;;  %368 = vst.msk [vmem:[#allocation2 + $0x38] sm:$0x1] %vm361_vm1, %v350_v26  ;;  %p2202_p13 = pnand %p2201_p12, %p2331_p4 }
  0x24   : > { %v3192_v8 = vrot.slane %v2374_v7, 1  ;;  %v3191_v9 = vrot.slane %v2374_v7, 2  ;;  %v3190_v10 = vrot.slane %v2374_v7, 3  ;;  %480 = vst [vmem:[#allocation1] ss:$9 sm:$0xff] %v2374_v7  ;;  %v3189_v11 = vrot.slane %v2374_v7, 4  ;;  %p2207_p3 = por %p2206_p2, %p2205_p1 }
  0x25   : > { %v3188_v12 = vrot.slane %v2374_v7, 5  ;;  %v3187_v13 = vrot.slane %v2374_v7, 6  ;;  %v3186_v14 = vrot.slane %v2374_v7, 7  ;;  %v2402_v17 = vld [vmem:[#allocation2 + $0x10] sm:$0xff]  ;;  %v2404_v18 = vld [vmem:[#allocation2 + $0x8] sm:$0x1]  ;;  %p2203_p0 = pneg %p2202_p13 }
  0x26   : > { %482 = vst [vmem:[#allocation1 + $0x1] ss:$9 sm:$0xff] %v3192_v8  ;;  %v3185_v19 = vrot.slane %v2402_v17, 1  ;;  %v3184_v21 = vrot.slane %v2402_v17, 2  ;;  %v3183_v22 = vrot.slane %v2402_v17, 3  ;;  %v3182_v23 = vrot.slane %v2402_v17, 4 }
  0x27   : > { %484 = vst [vmem:[#allocation1 + $0x2] ss:$9 sm:$0xff] %v3191_v9  ;;  %v3181_v24 = vrot.slane %v2402_v17, 5  ;;  %v3180_v25 = vrot.slane %v2402_v17, 6  ;;  %v2431_v28 = vld [vmem:[#allocation2 + $0x20] sm:$0xff]  ;;  %v3179_v29 = vrot.slane %v2402_v17, 7  ;;  %p2208_p5 = pnand %p2207_p3, %p2203_p0 }
  0x28   : > { %486 = vst [vmem:[#allocation1 + $0x3] ss:$9 sm:$0xff] %v3190_v10  ;;  %v2434_v30 = vld [vmem:[#allocation2 + $0x18] sm:$0x1]  ;;  %v3178_v32 = vrot.slane %v2431_v28, 1  ;;  %v3177_v33 = vrot.slane %v2431_v28, 2 }
  0x29   : > { %488 = vst [vmem:[#allocation1 + $0x4] ss:$9 sm:$0xff] %v3189_v11  ;;  %v3176_v34 = vrot.slane %v2431_v28, 3  ;;  %v3175_v35 = vrot.slane %v2431_v28, 4  ;;  %v3174_v36 = vrot.slane %v2431_v28, 5  ;;  %v3173_v39 = vrot.slane %v2431_v28, 6 }
  0x2a   : > { %490 = vst [vmem:[#allocation1 + $0x5] ss:$9 sm:$0xff] %v3188_v12  ;;  %v2461_v40 = vld [vmem:[#allocation2 + $0x30] sm:$0xff]  ;;  %v3172_v41 = vrot.slane %v2431_v28, 7  ;;  %v2464_v43 = vld [vmem:[#allocation2 + $0x28] sm:$0x1] }
  0x2b   : > { %492 = vst [vmem:[#allocation1 + $0x6] ss:$9 sm:$0xff] %v3187_v13  ;;  %v2468_v44 = vrot.slane %v2461_v40, 1  ;;  %v2473_v45 = vrot.slane %v2461_v40, 2  ;;  %v2478_v46 = vrot.slane %v2461_v40, 3  ;;  %v2482_v47 = vrot.slane %v2461_v40, 4 }
  0x2c   : > { %494 = vst [vmem:[#allocation1 + $0x7] ss:$9 sm:$0xff] %v3186_v14  ;;  %v2494_v50 = vrot.slane %v2461_v40, 5  ;;  %v2497_v51 = vrot.slane %v2461_v40, 6  ;;  %v2502_v53 = vrot.slane %v2461_v40, 7 }
  0x2d   : > { %369 = vst.msk [vmem:[#allocation2 + $0x40] sm:$0xff] %vm359_vm0, %v351_v27  ;;  %v2505_v55 = vld [vmem:[#allocation2 + $0x38] sm:$0x1] }
  0x2e   : > { %370 = vst.msk [vmem:[#allocation2 + $0x48] sm:$0x1] %vm361_vm1, %v352_v37 }
  0x2f   : > { %371 = vst.msk [vmem:[#allocation2 + $0x50] sm:$0xff] %vm359_vm0, %v353_v38 }
  0x30   : > { %372 = vst.msk [vmem:[#allocation2 + $0x58] sm:$0x1] %vm361_vm1, %v354_v48 }
  0x31   : > { %373 = vst.msk [vmem:[#allocation2 + $0x60] sm:$0xff] %vm359_vm0, %v355_v49 }
  0x32   : > { %374 = vst.msk [vmem:[#allocation2 + $0x68] sm:$0x1] %vm361_vm1, %v356_v59 }
  0x33   : > { %v495_v20 = vld [vmem:[#allocation1] sm:$0xff]  ;;  %375 = vst.msk [vmem:[#allocation2 + $0x70] sm:$0xff] %vm359_vm0, %v357_v60 }
  0x34   : > { %2073 = vmatmul.msk.f32.vlgmr.msra.gmra.mxu0 %vm359_vm0, %v495_v20  ;;  %496 = vst [vmem:[#allocation1] ss:$9 sm:$0xff] %v2404_v18  ;;  %v2499_v52 = vld [vmem:[#allocation2 + $0x40] sm:$0xff] }
  0x35   : > { %497 = vst [vmem:[#allocation1 + $0x1] ss:$9 sm:$0xff] %v2402_v17  ;;  %v2509_v56 = vrot.slane %v2499_v52, 1  ;;  %v2513_v57 = vrot.slane %v2499_v52, 2  ;;  %v2517_v58 = vrot.slane %v2499_v52, 3  ;;  %v2529_v61 = vrot.slane %v2499_v52, 4 }
  0x36   : > { %498 = vst [vmem:[#allocation1 + $0x2] ss:$9 sm:$0xff] %v3185_v19  ;;  %v2532_v62 = vrot.slane %v2499_v52, 5  ;;  %v2535_v63 = vrot.slane %v2499_v52, 6  ;;  %v2537_v1 = vld [vmem:[#allocation2 + $0x50] sm:$0xff]  ;;  %v2540_v2 = vrot.slane %v2499_v52, 7 }
  0x37   : > { %499 = vst [vmem:[#allocation1 + $0x3] ss:$9 sm:$0xff] %v3184_v21  ;;  %v2544_v3 = vld [vmem:[#allocation2 + $0x48] sm:$0x1]  ;;  %v2548_v4 = vrot.slane %v2537_v1, 1  ;;  %v2552_v5 = vrot.slane %v2537_v1, 2 }
  0x38   : > { %500 = vst [vmem:[#allocation1 + $0x4] ss:$9 sm:$0xff] %v3183_v22  ;;  %v2562_v15 = vrot.slane %v2537_v1, 3  ;;  %v2565_v16 = vrot.slane %v2537_v1, 4  ;;  %v2568_v20 = vrot.slane %v2537_v1, 5  ;;  %v2571_v27 = vrot.slane %v2537_v1, 6 }
  0x39   : > { %501 = vst [vmem:[#allocation1 + $0x5] ss:$9 sm:$0xff] %v3182_v23  ;;  %v2577_v37 = vrot.slane %v2537_v1, 7  ;;  %v2581_v38 = vld [vmem:[#allocation2 + $0x58] sm:$0x1] }
  0x3a   : > { %502 = vst [vmem:[#allocation1 + $0x6] ss:$9 sm:$0xff] %v3181_v24 }
  0x3b   : > { %503 = vst [vmem:[#allocation1 + $0x7] ss:$9 sm:$0xff] %v3180_v25 }
  0x3c   : > { %376 = vst.msk [vmem:[#allocation2 + $0x78] sm:$0x1] %vm361_vm1, %v358_v6 }
  0x42   : > { %v504_v31 = vld [vmem:[#allocation1] sm:$0xff] }
  0x43   : > { %2074 = vmatmul.msk.f32.gmra.mxu0 %vm359_vm0, %v504_v31  ;;  %505 = vst [vmem:[#allocation1] ss:$9 sm:$0xff] %v3179_v29  ;;  %v2574_v31 = vld [vmem:[#allocation2 + $0x60] sm:$0xff]  ;;  %v2649_v25 = vld [vmem:[#allocation2 + $0x78] sm:$0x1] }
  0x44   : > { %506 = vst [vmem:[#allocation1 + $0x1] ss:$9 sm:$0xff] %v2434_v30  ;;  %v2593_v48 = vrot.slane %v2574_v31, 2  ;;  %v2596_v49 = vrot.slane %v2574_v31, 3  ;;  %v2602_v60 = vrot.slane %v2574_v31, 5  ;;  %v2610_v6 = vrot.slane %v2574_v31, 7 }
  0x45   : > { %507 = vst [vmem:[#allocation1 + $0x2] ss:$9 sm:$0xff] %v2431_v28 }
  0x46   : > { %508 = vst [vmem:[#allocation1 + $0x3] ss:$9 sm:$0xff] %v3178_v32 }
  0x47   : > { %509 = vst [vmem:[#allocation1 + $0x4] ss:$9 sm:$0xff] %v3177_v33 }
  0x48   : > { %510 = vst [vmem:[#allocation1 + $0x5] ss:$9 sm:$0xff] %v3176_v34 }
  0x49   : > { %511 = vst [vmem:[#allocation1 + $0x6] ss:$9 sm:$0xff] %v3175_v35 }
  0x4a   : > { %512 = vst [vmem:[#allocation1 + $0x7] ss:$9 sm:$0xff] %v3174_v36 }
  0x4b   : > { %3227 = vst [vmem:[#allocation9_spill] sm:$0xff] %v2649_v25 }
  0x51   : > { %v513_v42 = vld [vmem:[#allocation1] sm:$0xff] }
  0x52   : > { %2075 = vmatmul.msk.f32.gmra.mxu0 %vm359_vm0, %v513_v42  ;;  %514 = vst [vmem:[#allocation1] ss:$9 sm:$0xff] %v3173_v39  ;;  %v2585_v42 = vrot.slane %v2574_v31, 1 }
  0x53   : > { %515 = vst [vmem:[#allocation1 + $0x1] ss:$9 sm:$0xff] %v3172_v41  ;;  %v2617_v41 = vld [vmem:[#allocation2 + $0x70] sm:$0xff] }
  0x54   : > { %516 = vst [vmem:[#allocation1 + $0x2] ss:$9 sm:$0xff] %v2464_v43  ;;  %v2627_v39 = vrot.slane %v2617_v41, 2  ;;  %v2630_v36 = vrot.slane %v2617_v41, 3  ;;  %v2633_v34 = vrot.slane %v2617_v41, 4  ;;  %v2637_v33 = vrot.slane %v2617_v41, 5 }
  0x55   : > { %517 = vst [vmem:[#allocation1 + $0x3] ss:$9 sm:$0xff] %v2461_v40  ;;  %v2641_v32 = vrot.slane %v2617_v41, 6  ;;  %v2645_v29 = vrot.slane %v2617_v41, 7 }
  0x56   : > { %518 = vst [vmem:[#allocation1 + $0x4] ss:$9 sm:$0xff] %v2468_v44 }
  0x57   : > { %519 = vst [vmem:[#allocation1 + $0x5] ss:$9 sm:$0xff] %v2473_v45 }
  0x58   : > { %520 = vst [vmem:[#allocation1 + $0x6] ss:$9 sm:$0xff] %v2478_v46 }
  0x59   : > { %521 = vst [vmem:[#allocation1 + $0x7] ss:$9 sm:$0xff] %v2482_v47 }
  0x5a   : > { %3225 = vst [vmem:[#allocation7_spill] sm:$0xff] %v2641_v32 }
  0x5b   : > { %3226 = vst [vmem:[#allocation8_spill] sm:$0xff] %v2645_v29 }
  0x60   : > { %v522_v54 = vld [vmem:[#allocation1] sm:$0xff] }
  0x61   : > { %2076 = vmatmul.msk.f32.gmra.mxu0 %vm359_vm0, %v522_v54  ;;  %523 = vst [vmem:[#allocation1] ss:$9 sm:$0xff] %v2494_v50  ;;  %v2599_v54 = vrot.slane %v2574_v31, 4 }
  0x62   : > { %524 = vst [vmem:[#allocation1 + $0x1] ss:$9 sm:$0xff] %v2497_v51 }
  0x63   : > { %525 = vst [vmem:[#allocation1 + $0x2] ss:$9 sm:$0xff] %v2502_v53 }
  0x64   : > { %526 = vst [vmem:[#allocation1 + $0x3] ss:$9 sm:$0xff] %v2505_v55 }
  0x65   : > { %527 = vst [vmem:[#allocation1 + $0x4] ss:$9 sm:$0xff] %v2499_v52 }
  0x66   : > { %528 = vst [vmem:[#allocation1 + $0x5] ss:$9 sm:$0xff] %v2509_v56 }
  0x67   : > { %529 = vst [vmem:[#allocation1 + $0x6] ss:$9 sm:$0xff] %v2513_v57 }
  0x68   : > { %530 = vst [vmem:[#allocation1 + $0x7] ss:$9 sm:$0xff] %v2517_v58 }
  0x6f   : > { %v531_v0 = vld [vmem:[#allocation1] sm:$0xff] }
  0x70   : > { %2077 = vmatmul.msk.f32.gmra.mxu0 %vm359_vm0, %v531_v0  ;;  %532 = vst [vmem:[#allocation1] ss:$9 sm:$0xff] %v2529_v61  ;;  %v2606_v0 = vrot.slane %v2574_v31, 6 }
  0x71   : > { %533 = vst [vmem:[#allocation1 + $0x1] ss:$9 sm:$0xff] %v2532_v62 }
  0x72   : > { %534 = vst [vmem:[#allocation1 + $0x2] ss:$9 sm:$0xff] %v2535_v63 }
  0x73   : > { %535 = vst [vmem:[#allocation1 + $0x3] ss:$9 sm:$0xff] %v2540_v2 }
  0x74   : > { %536 = vst [vmem:[#allocation1 + $0x4] ss:$9 sm:$0xff] %v2544_v3 }
  0x75   : > { %537 = vst [vmem:[#allocation1 + $0x5] ss:$9 sm:$0xff] %v2537_v1 }
  0x76   : > { %538 = vst [vmem:[#allocation1 + $0x6] ss:$9 sm:$0xff] %v2548_v4 }
  0x77   : > { %539 = vst [vmem:[#allocation1 + $0x7] ss:$9 sm:$0xff] %v2552_v5 }
  0x7e   : > { %v540_v26 = vld [vmem:[#allocation1] sm:$0xff] }
  0x7f   : > { %2078 = vmatmul.msk.f32.gmra.mxu0 %vm359_vm0, %v540_v26  ;;  %541 = vst [vmem:[#allocation1] ss:$9 sm:$0xff] %v2562_v15  ;;  %v2614_v26 = vld [vmem:[#allocation2 + $0x68] sm:$0x1] }
  0x80   : > { %542 = vst [vmem:[#allocation1 + $0x1] ss:$9 sm:$0xff] %v2565_v16 }
  0x81   : > { %543 = vst [vmem:[#allocation1 + $0x2] ss:$9 sm:$0xff] %v2568_v20 }
  0x82   : > { %544 = vst [vmem:[#allocation1 + $0x3] ss:$9 sm:$0xff] %v2571_v27 }
  0x83   : > { %545 = vst [vmem:[#allocation1 + $0x4] ss:$9 sm:$0xff] %v2577_v37 }
  0x84   : > { %546 = vst [vmem:[#allocation1 + $0x5] ss:$9 sm:$0xff] %v2581_v38 }
  0x85   : > { %547 = vst [vmem:[#allocation1 + $0x6] ss:$9 sm:$0xff] %v2574_v31 }
  0x86   : > { %548 = vst [vmem:[#allocation1 + $0x7] ss:$9 sm:$0xff] %v2585_v42 }
  0x8d   : > { %v549_v59 = vld [vmem:[#allocation1] sm:$0xff] }
  0x8e   : > { %2079 = vmatmul.msk.f32.gmra.mxu0 %vm359_vm0, %v549_v59  ;;  %550 = vst [vmem:[#allocation1] ss:$9 sm:$0xff] %v2593_v48  ;;  %v2624_v59 = vrot.slane %v2617_v41, 1 }
  0x8f   : > { %551 = vst [vmem:[#allocation1 + $0x1] ss:$9 sm:$0xff] %v2596_v49 }
  0x90   : > { %552 = vst [vmem:[#allocation1 + $0x2] ss:$9 sm:$0xff] %v2599_v54 }
  0x91   : > { %553 = vst [vmem:[#allocation1 + $0x3] ss:$9 sm:$0xff] %v2602_v60 }
  0x92   : > { %554 = vst [vmem:[#allocation1 + $0x4] ss:$9 sm:$0xff] %v2606_v0 }
  0x93   : > { %555 = vst [vmem:[#allocation1 + $0x5] ss:$9 sm:$0xff] %v2610_v6 }
  0x94   : > { %556 = vst [vmem:[#allocation1 + $0x6] ss:$9 sm:$0xff] %v2614_v26 }
  0x95   : > { %557 = vst [vmem:[#allocation1 + $0x7] ss:$9 sm:$0xff] %v2617_v41 }
  0x9c   : > { %v558_v35 = vld [vmem:[#allocation1] sm:$0xff] }
  0x9d   : > { %2080 = vmatmul.msk.f32.gmra.mxu0 %vm359_vm0, %v558_v35  ;;  %559 = vst [vmem:[#allocation1] ss:$9 sm:$0xff] %v2624_v59 }
  0x9e   : > { %560 = vst [vmem:[#allocation1 + $0x1] ss:$9 sm:$0xff] %v2627_v39 }
  0x9f   : > { %561 = vst [vmem:[#allocation1 + $0x2] ss:$9 sm:$0xff] %v2630_v36 }
  0xa0   : > { %562 = vst [vmem:[#allocation1 + $0x3] ss:$9 sm:$0xff] %v2633_v34 }
  0xa1   : > { %563 = vst [vmem:[#allocation1 + $0x4] ss:$9 sm:$0xff] %v2637_v33 }
  0xa2   : > { %564 = vst [vmem:[#allocation1 + $0x5] ss:$9 sm:$0xff] %v2641_v32 }
  0xa3   : > { %565 = vst [vmem:[#allocation1 + $0x6] ss:$9 sm:$0xff] %v2645_v29 }
  0xa4   : > { %566 = vst [vmem:[#allocation1 + $0x7] ss:$9 sm:$0xff] %v2649_v25 }
  0xab   : > { %v567_v35 = vld [vmem:[#allocation1] sm:$0xff] }
  0xac   : > { %2081 = vmatmul.msk.f32.gmra.mxu0 %vm359_vm0, %v567_v35 }
  0xb1   : > { %v603_v24 = vpop.f32.mrf.mxu0 }
  0xb2   : > { %v647_v23 = vrot.slane %v603_v24, 1  ;;  %v648_v22 = vrot.slane %v603_v24, 2  ;;  %v649_v21 = vrot.slane %v603_v24, 3  ;;  %703 = vst [vmem:[#allocation1] ss:$9 sm:$0xff] %v603_v24  ;;  %v650_v19 = vrot.slane %v603_v24, 4 }
  0xb3   : > { %v651_v14 = vrot.slane %v603_v24, 5  ;;  %v652_v13 = vrot.slane %v603_v24, 6  ;;  %v653_v12 = vrot.slane %v603_v24, 7 }
  0xb4   : > { %705 = vst [vmem:[#allocation1 + $0x1] ss:$9 sm:$0xff] %v647_v23 }
  0xb5   : > { %707 = vst [vmem:[#allocation1 + $0x2] ss:$9 sm:$0xff] %v648_v22 }
  0xb6   : > { %709 = vst [vmem:[#allocation1 + $0x3] ss:$9 sm:$0xff] %v649_v21 }
  0xb7   : > { %711 = vst [vmem:[#allocation1 + $0x4] ss:$9 sm:$0xff] %v650_v19 }
  0xb8   : > { %713 = vst [vmem:[#allocation1 + $0x5] ss:$9 sm:$0xff] %v651_v14 }
  0xb9   : > { %715 = vst [vmem:[#allocation1 + $0x6] ss:$9 sm:$0xff] %v652_v13 }
  0xba   : > { %717 = vst [vmem:[#allocation1 + $0x7] ss:$9 sm:$0xff] %v653_v12 }
  0xc0   : > { %v606_v11 = vpop.f32.mrf.mxu0 }
  0xc1   : > { %v2656_v10 = vld [vmem:[#allocation1] sm:$0xff]  ;;  %v654_v35 = vrot.slane %v606_v11, 1  ;;  %v655_v9 = vrot.slane %v606_v11, 2  ;;  %v656_v8 = vrot.slane %v606_v11, 3  ;;  %v657_v25 = vrot.slane %v606_v11, 4 }
  0xc2   : > { %3228 = vst [vmem:[#allocation10_spill] sm:$0xff] %v2656_v10  ;;  %v658_v29 = vrot.slane %v606_v11, 5  ;;  %v659_v32 = vrot.slane %v606_v11, 6  ;;  %v660_v23 = vrot.slane %v606_v11, 7 }
  0xc3   : > { %719 = vst [vmem:[#allocation1] ss:$9 sm:$0xff] %v654_v35 }
  0xc4   : > { %720 = vst [vmem:[#allocation1 + $0x1] ss:$9 sm:$0xff] %v655_v9 }
  0xc5   : > { %721 = vst [vmem:[#allocation1 + $0x2] ss:$9 sm:$0xff] %v656_v8 }
  0xc6   : > { %722 = vst [vmem:[#allocation1 + $0x3] ss:$9 sm:$0xff] %v657_v25 }
  0xc7   : > { %723 = vst [vmem:[#allocation1 + $0x4] ss:$9 sm:$0xff] %v658_v29 }
  0xc8   : > { %724 = vst [vmem:[#allocation1 + $0x5] ss:$9 sm:$0xff] %v659_v32 }
  0xc9   : > { %725 = vst [vmem:[#allocation1 + $0x6] ss:$9 sm:$0xff] %v660_v23 }
  0xcf   : > { %v609_v14 = vpop.f32.mrf.mxu0 }
  0xd0   : > { %726 = vst [vmem:[#allocation1 + $0x7] ss:$9 sm:$0xff] %v609_v14  ;;  %v661_v12 = vrot.slane %v609_v14, 2  ;;  %v662_v13 = vrot.slane %v609_v14, 3  ;;  %v663_v21 = vrot.slane %v609_v14, 4  ;;  %v664_v22 = vrot.slane %v609_v14, 5 }
  0xd1   : > { %v665_v24 = vrot.slane %v609_v14, 6  ;;  %v666_v35 = vrot.slane %v609_v14, 7 }
  0xd7   : > { %v2658_v19 = vld [vmem:[#allocation1] sm:$0xff] }
  0xd8   : > { %3229 = vst [vmem:[#allocation11_spill] sm:$0xff] %v2658_v19 }
  0xd9   : > { %728 = vst [vmem:[#allocation1] ss:$9 sm:$0xff] %v661_v12 }
  0xda   : > { %729 = vst [vmem:[#allocation1 + $0x1] ss:$9 sm:$0xff] %v662_v13 }
  0xdb   : > { %730 = vst [vmem:[#allocation1 + $0x2] ss:$9 sm:$0xff] %v663_v21 }
  0xdc   : > { %731 = vst [vmem:[#allocation1 + $0x3] ss:$9 sm:$0xff] %v664_v22 }
  0xdd   : > { %732 = vst [vmem:[#allocation1 + $0x4] ss:$9 sm:$0xff] %v665_v24 }
  0xde   : > { %733 = vst [vmem:[#allocation1 + $0x5] ss:$9 sm:$0xff] %v666_v35  ;;  %v612_v8 = vpop.f32.mrf.mxu0 }
  0xdf   : > { %v667_v9 = vrot.slane %v612_v8, 1  ;;  %734 = vst [vmem:[#allocation1 + $0x6] ss:$9 sm:$0xff] %v612_v8  ;;  %v668_v11 = vrot.slane %v612_v8, 3  ;;  %v669_v25 = vrot.slane %v612_v8, 4  ;;  %v670_v32 = vrot.slane %v612_v8, 5 }
  0xe0   : > { %v671_v23 = vrot.slane %v612_v8, 6  ;;  %v672_v12 = vrot.slane %v612_v8, 7 }
  0xe1   : > { %735 = vst [vmem:[#allocation1 + $0x7] ss:$9 sm:$0xff] %v667_v9 }
  0xe8   : > { %v2660_v29 = vld [vmem:[#allocation1] sm:$0xff] }
  0xe9   : > { %3230 = vst [vmem:[#allocation12_spill] sm:$0xff] %v2660_v29 }
  0xea   : > { %737 = vst [vmem:[#allocation1] ss:$9 sm:$0xff] %v668_v11 }
  0xeb   : > { %738 = vst [vmem:[#allocation1 + $0x1] ss:$9 sm:$0xff] %v669_v25 }
  0xec   : > { %739 = vst [vmem:[#allocation1 + $0x2] ss:$9 sm:$0xff] %v670_v32 }
  0xed   : > { %740 = vst [vmem:[#allocation1 + $0x3] ss:$9 sm:$0xff] %v671_v23  ;;  %v615_v14 = vpop.f32.mrf.mxu0 }
  0xee   : > { %741 = vst [vmem:[#allocation1 + $0x4] ss:$9 sm:$0xff] %v672_v12  ;;  %v673_v13 = vrot.slane %v615_v14, 1  ;;  %v674_v21 = vrot.slane %v615_v14, 2  ;;  %v675_v22 = vrot.slane %v615_v14, 4  ;;  %v676_v24 = vrot.slane %v615_v14, 5 }
  0xef   : > { %742 = vst [vmem:[#allocation1 + $0x5] ss:$9 sm:$0xff] %v615_v14  ;;  %v677_v9 = vrot.slane %v615_v14, 6  ;;  %v678_v29 = vrot.slane %v615_v14, 7 }
  0xf0   : > { %743 = vst [vmem:[#allocation1 + $0x6] ss:$9 sm:$0xff] %v673_v13 }
  0xf1   : > { %744 = vst [vmem:[#allocation1 + $0x7] ss:$9 sm:$0xff] %v674_v21 }
  0xf8   : > { %v2662_v35 = vld [vmem:[#allocation1] sm:$0xff] }
  0xf9   : > { %3231 = vst [vmem:[#allocation13_spill] sm:$0xff] %v2662_v35 }
  0xfa   : > { %746 = vst [vmem:[#allocation1] ss:$9 sm:$0xff] %v675_v22 }
  0xfb   : > { %747 = vst [vmem:[#allocation1 + $0x1] ss:$9 sm:$0xff] %v676_v24 }
  0xfc   : > { %748 = vst [vmem:[#allocation1 + $0x2] ss:$9 sm:$0xff] %v677_v9  ;;  %v618_v8 = vpop.f32.mrf.mxu0 }
  0xfd   : > { %749 = vst [vmem:[#allocation1 + $0x3] ss:$9 sm:$0xff] %v678_v29  ;;  %v679_v11 = vrot.slane %v618_v8, 1  ;;  %v680_v25 = vrot.slane %v618_v8, 2  ;;  %v681_v32 = vrot.slane %v618_v8, 3  ;;  %v682_v23 = vrot.slane %v618_v8, 5 }
  0xfe   : > { %750 = vst [vmem:[#allocation1 + $0x4] ss:$9 sm:$0xff] %v618_v8  ;;  %v683_v12 = vrot.slane %v618_v8, 6  ;;  %v684_v21 = vrot.slane %v618_v8, 7 }
  0xff   : > { %751 = vst [vmem:[#allocation1 + $0x5] ss:$9 sm:$0xff] %v679_v11 }
 0x100   : > { %752 = vst [vmem:[#allocation1 + $0x6] ss:$9 sm:$0xff] %v680_v25 }
 0x101   : > { %753 = vst [vmem:[#allocation1 + $0x7] ss:$9 sm:$0xff] %v681_v32 }
 0x108   : > { %v2664_v13 = vld [vmem:[#allocation1] sm:$0xff] }
 0x109   : > { %3232 = vst [vmem:[#allocation14_spill] sm:$0xff] %v2664_v13 }
 0x10a   : > { %755 = vst [vmem:[#allocation1] ss:$9 sm:$0xff] %v682_v23 }
 0x10b   : > { %756 = vst [vmem:[#allocation1 + $0x1] ss:$9 sm:$0xff] %v683_v12  ;;  %v621_v14 = vpop.f32.mrf.mxu0 }
 0x10c   : > { %757 = vst [vmem:[#allocation1 + $0x2] ss:$9 sm:$0xff] %v684_v21  ;;  %v685_v22 = vrot.slane %v621_v14, 1  ;;  %v686_v24 = vrot.slane %v621_v14, 2  ;;  %v687_v29 = vrot.slane %v621_v14, 3  ;;  %v688_v9 = vrot.slane %v621_v14, 4 }
 0x10d   : > { %758 = vst [vmem:[#allocation1 + $0x3] ss:$9 sm:$0xff] %v621_v14  ;;  %v689_v11 = vrot.slane %v621_v14, 6  ;;  %v690_v25 = vrot.slane %v621_v14, 7 }
 0x10e   : > { %759 = vst [vmem:[#allocation1 + $0x4] ss:$9 sm:$0xff] %v685_v22 }
 0x10f   : > { %760 = vst [vmem:[#allocation1 + $0x5] ss:$9 sm:$0xff] %v686_v24 }
 0x110   : > { %761 = vst [vmem:[#allocation1 + $0x6] ss:$9 sm:$0xff] %v687_v29 }
 0x111   : > { %762 = vst [vmem:[#allocation1 + $0x7] ss:$9 sm:$0xff] %v688_v9 }
 0x118   : > { %v2666_v32 = vld [vmem:[#allocation1] sm:$0xff] }
 0x119   : > { %3233 = vst [vmem:[#allocation15_spill] sm:$0xff] %v2666_v32 }
 0x11a   : > { %764 = vst [vmem:[#allocation1] ss:$9 sm:$0xff] %v689_v11  ;;  %v624_v8 = vpop.f32.mrf.mxu0 }
 0x11b   : > { %765 = vst [vmem:[#allocation1 + $0x1] ss:$9 sm:$0xff] %v690_v25  ;;  %v691_v23 = vrot.slane %v624_v8, 1  ;;  %v692_v12 = vrot.slane %v624_v8, 2  ;;  %v693_v21 = vrot.slane %v624_v8, 3  ;;  %v694_v13 = vrot.slane %v624_v8, 4 }
 0x11c   : > { %766 = vst [vmem:[#allocation1 + $0x2] ss:$9 sm:$0xff] %v624_v8  ;;  %v695_v35 = vrot.slane %v624_v8, 5  ;;  %v696_v22 = vrot.slane %v624_v8, 7  ;;  %v3237_v8 = vrot.slane %v2374_v7, 2 }
 0x11d   : > { %767 = vst [vmem:[#allocation1 + $0x3] ss:$9 sm:$0xff] %v691_v23  ;;  %v3238_v23 = vrot.slane %v2374_v7, 3 }
 0x11e   : > { %768 = vst [vmem:[#allocation1 + $0x4] ss:$9 sm:$0xff] %v692_v12  ;;  %v3239_v12 = vrot.slane %v2374_v7, 4 }
 0x11f   : > { %769 = vst [vmem:[#allocation1 + $0x5] ss:$9 sm:$0xff] %v693_v21  ;;  %v3240_v21 = vrot.slane %v2374_v7, 5 }
 0x120   : > { %770 = vst [vmem:[#allocation1 + $0x6] ss:$9 sm:$0xff] %v694_v13 }
 0x121   : > { %771 = vst [vmem:[#allocation1 + $0x7] ss:$9 sm:$0xff] %v695_v35  ;;  %v3236_v35 = vrot.slane %v2374_v7, 1 }
 0x128   : > { %v2668_v24 = vld [vmem:[#allocation1] sm:$0xff] }
 0x129   : > { %3234 = vst [vmem:[#allocation16_spill] sm:$0xff] %v2668_v24  ;;  %v627_v14 = vpop.f32.mrf.mxu0 }
 0x12a   : > { %773 = vst [vmem:[#allocation1] ss:$9 sm:$0xff] %v696_v22  ;;  %v697_v29 = vrot.slane %v627_v14, 1  ;;  %v698_v9 = vrot.slane %v627_v14, 2  ;;  %v699_v11 = vrot.slane %v627_v14, 3  ;;  %v700_v25 = vrot.slane %v627_v14, 4 }
 0x12b   : > { %774 = vst [vmem:[#allocation1 + $0x1] ss:$9 sm:$0xff] %v627_v14  ;;  %v701_v32 = vrot.slane %v627_v14, 5  ;;  %v702_v19 = vrot.slane %v627_v14, 6  ;;  %v3243_v14 = vrot.slane %v2402_v17, 1 }
 0x12c   : > { %775 = vst [vmem:[#allocation1 + $0x2] ss:$9 sm:$0xff] %v697_v29  ;;  %v3244_v29 = vrot.slane %v2402_v17, 2 }
 0x12d   : > { %776 = vst [vmem:[#allocation1 + $0x3] ss:$9 sm:$0xff] %v698_v9  ;;  %v3245_v9 = vrot.slane %v2402_v17, 3 }
 0x12e   : > { %777 = vst [vmem:[#allocation1 + $0x4] ss:$9 sm:$0xff] %v699_v11  ;;  %v3246_v11 = vrot.slane %v2402_v17, 4 }
 0x12f   : > { %778 = vst [vmem:[#allocation1 + $0x5] ss:$9 sm:$0xff] %v700_v25  ;;  %v3248_v25 = vrot.slane %v2402_v17, 6 }
 0x130   : > { %779 = vst [vmem:[#allocation1 + $0x6] ss:$9 sm:$0xff] %v701_v32  ;;  %v3242_v32 = vrot.slane %v2374_v7, 7 }
 0x131   : > { %780 = vst [vmem:[#allocation1 + $0x7] ss:$9 sm:$0xff] %v702_v19  ;;  %v3241_v19 = vrot.slane %v2374_v7, 6 }
 0x138   : > { %v2670_v13 = vld [vmem:[#allocation1] sm:$0xff] }
 0x139   : > { %3235 = vst [vmem:[#allocation17_spill] sm:$0xff] %v2670_v13 }
 0x13a   : > { %809 = vst [vmem:[#allocation1] ss:$9 sm:$0xff] %v2374_v7  ;;  %v3247_v7 = vrot.slane %v2402_v17, 5 }
 0x13b   : > { %811 = vst [vmem:[#allocation1 + $0x1] ss:$9 sm:$0xff] %v3236_v35  ;;  %v3249_v35 = vrot.slane %v2402_v17, 7 }
 0x13c   : > { %813 = vst [vmem:[#allocation1 + $0x2] ss:$9 sm:$0xff] %v3237_v8  ;;  %v3250_v8 = vrot.slane %v2431_v28, 1 }
 0x13d   : > { %815 = vst [vmem:[#allocation1 + $0x3] ss:$9 sm:$0xff] %v3238_v23  ;;  %v3251_v23 = vrot.slane %v2431_v28, 2 }
 0x13e   : > { %817 = vst [vmem:[#allocation1 + $0x4] ss:$9 sm:$0xff] %v3239_v12  ;;  %v3252_v12 = vrot.slane %v2431_v28, 3 }
 0x13f   : > { %819 = vst [vmem:[#allocation1 + $0x5] ss:$9 sm:$0xff] %v3240_v21  ;;  %v2083_v21 = vld [vmem:[%s3169_s2 + $0x18] sm:$0xff] }
 0x140   : > { %821 = vst [vmem:[#allocation1 + $0x6] ss:$9 sm:$0xff] %v3241_v19  ;;  %929 = vmatpush.msra.mxu1 %v2083_v21  ;;  %v2082_v19 = vld [vmem:[%s3169_s2 + $0x10] sm:$0xff] }
 0x141   : > { %823 = vst [vmem:[#allocation1 + $0x7] ss:$9 sm:$0xff] %v3242_v32 }
 0x142   : > { %930 = vmatpush.msra.mxu1 %v2082_v19 }
 0x148   : > { %v824_v22 = vld [vmem:[#allocation1] sm:$0xff] }
 0x149   : > { %825 = vst [vmem:[#allocation1] ss:$9 sm:$0xff] %v2404_v18  ;;  %2084 = vmatmul.msk.f32.vlgmr.msra.gmra.mxu1 %vm359_vm0, %v824_v22 }
 0x14a   : > { %826 = vst [vmem:[#allocation1 + $0x1] ss:$9 sm:$0xff] %v2402_v17  ;;  %v3253_v17 = vrot.slane %v2431_v28, 4 }
 0x14b   : > { %827 = vst [vmem:[#allocation1 + $0x2] ss:$9 sm:$0xff] %v3243_v14  ;;  %v3255_v14 = vrot.slane %v2431_v28, 6 }
 0x14c   : > { %828 = vst [vmem:[#allocation1 + $0x3] ss:$9 sm:$0xff] %v3244_v29  ;;  %v3256_v29 = vrot.slane %v2431_v28, 7 }
 0x14d   : > { %829 = vst [vmem:[#allocation1 + $0x4] ss:$9 sm:$0xff] %v3245_v9  ;;  %v3258_v9 = vld [vmem:[#allocation8_spill] sm:$0xff] }
 0x14e   : > { %830 = vst [vmem:[#allocation1 + $0x5] ss:$9 sm:$0xff] %v3246_v11 }
 0x14f   : > { %831 = vst [vmem:[#allocation1 + $0x6] ss:$9 sm:$0xff] %v3247_v7 }
 0x150   : > { %832 = vst [vmem:[#allocation1 + $0x7] ss:$9 sm:$0xff] %v3248_v25 }
 0x157   : > { %v833_v18 = vld [vmem:[#allocation1] sm:$0xff] }
 0x158   : > { %834 = vst [vmem:[#allocation1] ss:$9 sm:$0xff] %v3249_v35  ;;  %2085 = vmatmul.msk.f32.gmra.mxu1 %vm359_vm0, %v833_v18 }
 0x159   : > { %835 = vst [vmem:[#allocation1 + $0x1] ss:$9 sm:$0xff] %v2434_v30  ;;  %v3254_v30 = vrot.slane %v2431_v28, 5 }
 0x15a   : > { %836 = vst [vmem:[#allocation1 + $0x2] ss:$9 sm:$0xff] %v2431_v28 }
 0x15b   : > { %837 = vst [vmem:[#allocation1 + $0x3] ss:$9 sm:$0xff] %v3250_v8 }
 0x15c   : > { %838 = vst [vmem:[#allocation1 + $0x4] ss:$9 sm:$0xff] %v3251_v23 }
 0x15d   : > { %839 = vst [vmem:[#allocation1 + $0x5] ss:$9 sm:$0xff] %v3252_v12 }
 0x15e   : > { %840 = vst [vmem:[#allocation1 + $0x6] ss:$9 sm:$0xff] %v3253_v17 }
 0x15f   : > { %841 = vst [vmem:[#allocation1 + $0x7] ss:$9 sm:$0xff] %v3254_v30 }
 0x166   : > { %v842_v32 = vld [vmem:[#allocation1] sm:$0xff] }
 0x167   : > { %843 = vst [vmem:[#allocation1] ss:$9 sm:$0xff] %v3255_v14  ;;  %2086 = vmatmul.msk.f32.gmra.mxu1 %vm359_vm0, %v842_v32 }
 0x168   : > { %844 = vst [vmem:[#allocation1 + $0x1] ss:$9 sm:$0xff] %v3256_v29 }
 0x169   : > { %845 = vst [vmem:[#allocation1 + $0x2] ss:$9 sm:$0xff] %v2464_v43 }
 0x16a   : > { %846 = vst [vmem:[#allocation1 + $0x3] ss:$9 sm:$0xff] %v2461_v40 }
 0x16b   : > { %847 = vst [vmem:[#allocation1 + $0x4] ss:$9 sm:$0xff] %v2468_v44 }
 0x16c   : > { %848 = vst [vmem:[#allocation1 + $0x5] ss:$9 sm:$0xff] %v2473_v45 }
 0x16d   : > { %849 = vst [vmem:[#allocation1 + $0x6] ss:$9 sm:$0xff] %v2478_v46 }
 0x16e   : > { %850 = vst [vmem:[#allocation1 + $0x7] ss:$9 sm:$0xff] %v2482_v47 }
 0x175   : > { %v851_v22 = vld [vmem:[#allocation1] sm:$0xff] }
 0x176   : > { %852 = vst [vmem:[#allocation1] ss:$9 sm:$0xff] %v2494_v50  ;;  %2087 = vmatmul.msk.f32.gmra.mxu1 %vm359_vm0, %v851_v22 }
 0x177   : > { %853 = vst [vmem:[#allocation1 + $0x1] ss:$9 sm:$0xff] %v2497_v51 }
 0x178   : > { %854 = vst [vmem:[#allocation1 + $0x2] ss:$9 sm:$0xff] %v2502_v53 }
 0x179   : > { %855 = vst [vmem:[#allocation1 + $0x3] ss:$9 sm:$0xff] %v2505_v55 }
 0x17a   : > { %856 = vst [vmem:[#allocation1 + $0x4] ss:$9 sm:$0xff] %v2499_v52 }
 0x17b   : > { %857 = vst [vmem:[#allocation1 + $0x5] ss:$9 sm:$0xff] %v2509_v56 }
 0x17c   : > { %858 = vst [vmem:[#allocation1 + $0x6] ss:$9 sm:$0xff] %v2513_v57 }
 0x17d   : > { %859 = vst [vmem:[#allocation1 + $0x7] ss:$9 sm:$0xff] %v2517_v58 }
 0x184   : > { %v860_v28 = vld [vmem:[#allocation1] sm:$0xff] }
 0x185   : > { %861 = vst [vmem:[#allocation1] ss:$9 sm:$0xff] %v2529_v61  ;;  %2088 = vmatmul.msk.f32.gmra.mxu1 %vm359_vm0, %v860_v28 }
 0x186   : > { %862 = vst [vmem:[#allocation1 + $0x1] ss:$9 sm:$0xff] %v2532_v62 }
 0x187   : > { %863 = vst [vmem:[#allocation1 + $0x2] ss:$9 sm:$0xff] %v2535_v63 }
 0x188   : > { %864 = vst [vmem:[#allocation1 + $0x3] ss:$9 sm:$0xff] %v2540_v2 }
 0x189   : > { %865 = vst [vmem:[#allocation1 + $0x4] ss:$9 sm:$0xff] %v2544_v3 }
 0x18a   : > { %866 = vst [vmem:[#allocation1 + $0x5] ss:$9 sm:$0xff] %v2537_v1 }
 0x18b   : > { %867 = vst [vmem:[#allocation1 + $0x6] ss:$9 sm:$0xff] %v2548_v4 }
 0x18c   : > { %868 = vst [vmem:[#allocation1 + $0x7] ss:$9 sm:$0xff] %v2552_v5 }
 0x193   : > { %v869_v43 = vld [vmem:[#allocation1] sm:$0xff] }
 0x194   : > { %870 = vst [vmem:[#allocation1] ss:$9 sm:$0xff] %v2562_v15  ;;  %2089 = vmatmul.msk.f32.gmra.mxu1 %vm359_vm0, %v869_v43 }
 0x195   : > { %871 = vst [vmem:[#allocation1 + $0x1] ss:$9 sm:$0xff] %v2565_v16 }
 0x196   : > { %872 = vst [vmem:[#allocation1 + $0x2] ss:$9 sm:$0xff] %v2568_v20 }
 0x197   : > { %873 = vst [vmem:[#allocation1 + $0x3] ss:$9 sm:$0xff] %v2571_v27 }
 0x198   : > { %874 = vst [vmem:[#allocation1 + $0x4] ss:$9 sm:$0xff] %v2577_v37 }
 0x199   : > { %875 = vst [vmem:[#allocation1 + $0x5] ss:$9 sm:$0xff] %v2581_v38  ;;  %v3257_v38 = vld [vmem:[#allocation7_spill] sm:$0xff] }
 0x19a   : > { %876 = vst [vmem:[#allocation1 + $0x6] ss:$9 sm:$0xff] %v2574_v31 }
 0x19b   : > { %877 = vst [vmem:[#allocation1 + $0x7] ss:$9 sm:$0xff] %v2585_v42 }
 0x1a2   : > { %v878_v55 = vld [vmem:[#allocation1] sm:$0xff] }
 0x1a3   : > { %879 = vst [vmem:[#allocation1] ss:$9 sm:$0xff] %v2593_v48  ;;  %2090 = vmatmul.msk.f32.gmra.mxu1 %vm359_vm0, %v878_v55 }
 0x1a4   : > { %880 = vst [vmem:[#allocation1 + $0x1] ss:$9 sm:$0xff] %v2596_v49 }
 0x1a5   : > { %881 = vst [vmem:[#allocation1 + $0x2] ss:$9 sm:$0xff] %v2599_v54 }
 0x1a6   : > { %882 = vst [vmem:[#allocation1 + $0x3] ss:$9 sm:$0xff] %v2602_v60 }
 0x1a7   : > { %883 = vst [vmem:[#allocation1 + $0x4] ss:$9 sm:$0xff] %v2606_v0 }
 0x1a8   : > { %884 = vst [vmem:[#allocation1 + $0x5] ss:$9 sm:$0xff] %v2610_v6 }
 0x1a9   : > { %885 = vst [vmem:[#allocation1 + $0x6] ss:$9 sm:$0xff] %v2614_v26  ;;  %v3259_v26 = vld [vmem:[#allocation9_spill] sm:$0xff] }
 0x1aa   : > { %886 = vst [vmem:[#allocation1 + $0x7] ss:$9 sm:$0xff] %v2617_v41 }
 0x1b1   : > { %v887_v3 = vld [vmem:[#allocation1] sm:$0xff] }
 0x1b2   : > { %888 = vst [vmem:[#allocation1] ss:$9 sm:$0xff] %v2624_v59  ;;  %2091 = vmatmul.msk.f32.gmra.mxu1 %vm359_vm0, %v887_v3 }
 0x1b3   : > { %889 = vst [vmem:[#allocation1 + $0x1] ss:$9 sm:$0xff] %v2627_v39 }
 0x1b4   : > { %890 = vst [vmem:[#allocation1 + $0x2] ss:$9 sm:$0xff] %v2630_v36 }
 0x1b5   : > { %891 = vst [vmem:[#allocation1 + $0x3] ss:$9 sm:$0xff] %v2633_v34 }
 0x1b6   : > { %892 = vst [vmem:[#allocation1 + $0x4] ss:$9 sm:$0xff] %v2637_v33 }
 0x1b7   : > { %893 = vst [vmem:[#allocation1 + $0x5] ss:$9 sm:$0xff] %v3257_v38 }
 0x1b8   : > { %894 = vst [vmem:[#allocation1 + $0x6] ss:$9 sm:$0xff] %v3258_v9 }
 0x1b9   : > { %895 = vst [vmem:[#allocation1 + $0x7] ss:$9 sm:$0xff] %v3259_v26 }
 0x1c0   : > { %v896_v11 = vld [vmem:[#allocation1] sm:$0xff] }
 0x1c1   : > { %2092 = vmatmul.msk.f32.gmra.mxu1 %vm359_vm0, %v896_v11 }
 0x1c6   : > { %v932_v7 = vpop.f32.mrf.mxu1 }
 0x1c7   : > { %v976_v25 = vrot.slane %v932_v7, 1  ;;  %v977_v18 = vrot.slane %v932_v7, 2  ;;  %v978_v35 = vrot.slane %v932_v7, 3  ;;  %v979_v8 = vrot.slane %v932_v7, 4 }
 0x1c8   : > { %v980_v23 = vrot.slane %v932_v7, 5  ;;  %v981_v12 = vrot.slane %v932_v7, 6  ;;  %v982_v21 = vrot.slane %v932_v7, 7 }
 0x1c9   : > { %1032 = vst [vmem:[#allocation1] ss:$9 sm:$0xff] %v976_v25 }
 0x1ca   : > { %1034 = vst [vmem:[#allocation1 + $0x1] ss:$9 sm:$0xff] %v977_v18 }
 0x1cb   : > { %1036 = vst [vmem:[#allocation1 + $0x2] ss:$9 sm:$0xff] %v978_v35 }
 0x1cc   : > { %1038 = vst [vmem:[#allocation1 + $0x3] ss:$9 sm:$0xff] %v979_v8 }
 0x1cd   : > { %1040 = vst [vmem:[#allocation1 + $0x4] ss:$9 sm:$0xff] %v980_v23 }
 0x1ce   : > { %1042 = vst [vmem:[#allocation1 + $0x5] ss:$9 sm:$0xff] %v981_v12 }
 0x1cf   : > { %1044 = vst [vmem:[#allocation1 + $0x6] ss:$9 sm:$0xff] %v982_v21 }
 0x1d5   : > { %v935_v17 = vpop.f32.mrf.mxu1 }
 0x1d6   : > { %1046 = vst [vmem:[#allocation1 + $0x7] ss:$9 sm:$0xff] %v935_v17  ;;  %v983_v30 = vrot.slane %v935_v17, 2  ;;  %v984_v19 = vrot.slane %v935_v17, 3  ;;  %v985_v14 = vrot.slane %v935_v17, 4  ;;  %v986_v22 = vrot.slane %v935_v17, 5 }
 0x1d7   : > { %v987_v28 = vrot.slane %v935_v17, 6  ;;  %v988_v43 = vrot.slane %v935_v17, 7 }
 0x1dd   : > { %v2780_v32 = vld [vmem:[#allocation1] sm:$0xff] }
 0x1de   : > { %3260 = vst [vmem:[#allocation7_spill] sm:$0xff] %v2780_v32 }
 0x1df   : > { %1048 = vst [vmem:[#allocation1] ss:$9 sm:$0xff] %v983_v30 }
 0x1e0   : > { %1049 = vst [vmem:[#allocation1 + $0x1] ss:$9 sm:$0xff] %v984_v19 }
 0x1e1   : > { %1050 = vst [vmem:[#allocation1 + $0x2] ss:$9 sm:$0xff] %v985_v14 }
 0x1e2   : > { %1051 = vst [vmem:[#allocation1 + $0x3] ss:$9 sm:$0xff] %v986_v22 }
 0x1e3   : > { %1052 = vst [vmem:[#allocation1 + $0x4] ss:$9 sm:$0xff] %v987_v28 }
 0x1e4   : > { %v938_v29 = vpop.f32.mrf.mxu1  ;;  %1053 = vst [vmem:[#allocation1 + $0x5] ss:$9 sm:$0xff] %v988_v43 }
 0x1e5   : > { %v989_v55 = vrot.slane %v938_v29, 1  ;;  %1054 = vst [vmem:[#allocation1 + $0x6] ss:$9 sm:$0xff] %v938_v29  ;;  %v990_v3 = vrot.slane %v938_v29, 3  ;;  %v991_v26 = vrot.slane %v938_v29, 4  ;;  %v992_v25 = vrot.slane %v938_v29, 5 }
 0x1e6   : > { %v993_v18 = vrot.slane %v938_v29, 6  ;;  %v994_v35 = vrot.slane %v938_v29, 7 }
 0x1e7   : > { %1055 = vst [vmem:[#allocation1 + $0x7] ss:$9 sm:$0xff] %v989_v55 }
 0x1ee   : > { %v2782_v11 = vld [vmem:[#allocation1] sm:$0xff] }
 0x1ef   : > { %3261 = vst [vmem:[#allocation8_spill] sm:$0xff] %v2782_v11 }
 0x1f0   : > { %1057 = vst [vmem:[#allocation1] ss:$9 sm:$0xff] %v990_v3 }
 0x1f1   : > { %1058 = vst [vmem:[#allocation1 + $0x1] ss:$9 sm:$0xff] %v991_v26 }
 0x1f2   : > { %1059 = vst [vmem:[#allocation1 + $0x2] ss:$9 sm:$0xff] %v992_v25 }
 0x1f3   : > { %v941_v7 = vpop.f32.mrf.mxu1  ;;  %1060 = vst [vmem:[#allocation1 + $0x3] ss:$9 sm:$0xff] %v993_v18 }
 0x1f4   : > { %v995_v8 = vrot.slane %v941_v7, 1  ;;  %v996_v23 = vrot.slane %v941_v7, 2  ;;  %1061 = vst [vmem:[#allocation1 + $0x4] ss:$9 sm:$0xff] %v994_v35  ;;  %v997_v12 = vrot.slane %v941_v7, 4  ;;  %v998_v17 = vrot.slane %v941_v7, 5 }
 0x1f5   : > { %1062 = vst [vmem:[#allocation1 + $0x5] ss:$9 sm:$0xff] %v941_v7  ;;  %v999_v19 = vrot.slane %v941_v7, 6  ;;  %v1000_v14 = vrot.slane %v941_v7, 7 }
 0x1f6   : > { %1063 = vst [vmem:[#allocation1 + $0x6] ss:$9 sm:$0xff] %v995_v8 }
 0x1f7   : > { %1064 = vst [vmem:[#allocation1 + $0x7] ss:$9 sm:$0xff] %v996_v23 }
 0x1fe   : > { %v2784_v30 = vld [vmem:[#allocation1] sm:$0xff] }
 0x1ff   : > { %3262 = vst [vmem:[#allocation9_spill] sm:$0xff] %v2784_v30 }
 0x200   : > { %1066 = vst [vmem:[#allocation1] ss:$9 sm:$0xff] %v997_v12  ;;  %v377_v12 = vld [vmem:[%s332_s29] sm:$0xff] }
 0x201   : > { %1067 = vst [vmem:[#allocation1 + $0x1] ss:$9 sm:$0xff] %v998_v17 }
 0x202   : > { %v944_v21 = vpop.f32.mrf.mxu1  ;;  %1068 = vst [vmem:[#allocation1 + $0x2] ss:$9 sm:$0xff] %v999_v19 }
 0x203   : > { %v1001_v22 = vrot.slane %v944_v21, 1  ;;  %v1002_v29 = vrot.slane %v944_v21, 2  ;;  %1069 = vst [vmem:[#allocation1 + $0x3] ss:$9 sm:$0xff] %v1000_v14  ;;  %v1003_v28 = vrot.slane %v944_v21, 3  ;;  %v1004_v55 = vrot.slane %v944_v21, 5 }
 0x204   : > { %1070 = vst [vmem:[#allocation1 + $0x4] ss:$9 sm:$0xff] %v944_v21  ;;  %v1005_v3 = vrot.slane %v944_v21, 6  ;;  %v1006_v25 = vrot.slane %v944_v21, 7  ;;  %v378_v21 = vld [vmem:[%s332_s29 + $0x8] sm:$0x1] }
 0x205   : > { %1071 = vst [vmem:[#allocation1 + $0x5] ss:$9 sm:$0xff] %v1001_v22 }
 0x206   : > { %1072 = vst [vmem:[#allocation1 + $0x6] ss:$9 sm:$0xff] %v1002_v29 }
 0x207   : > { %1073 = vst [vmem:[#allocation1 + $0x7] ss:$9 sm:$0xff] %v1003_v28 }
 0x208   : > { %380 = vst.msk [vmem:[#allocation2 + $0x80] sm:$0xff] %vm359_vm0, %v377_v12 }
 0x209   : > { %381 = vst.msk [vmem:[#allocation2 + $0x88] sm:$0x1] %vm361_vm1, %v378_v21 }
 0x20e   : > { %v2786_v26 = vld [vmem:[#allocation1] sm:$0xff] }
 0x20f   : > { %3263 = vst [vmem:[#allocation18_spill] sm:$0xff] %v2786_v26 }
 0x210   : > { %1075 = vst [vmem:[#allocation1] ss:$9 sm:$0xff] %v1004_v55 }
 0x211   : > { %v947_v43 = vpop.f32.mrf.mxu1  ;;  %1076 = vst [vmem:[#allocation1 + $0x1] ss:$9 sm:$0xff] %v1005_v3 }
 0x212   : > { %v1007_v18 = vrot.slane %v947_v43, 1  ;;  %v1008_v7 = vrot.slane %v947_v43, 2  ;;  %1077 = vst [vmem:[#allocation1 + $0x2] ss:$9 sm:$0xff] %v1006_v25  ;;  %v1009_v35 = vrot.slane %v947_v43, 3  ;;  %v1010_v8 = vrot.slane %v947_v43, 4 }
 0x213   : > { %1078 = vst [vmem:[#allocation1 + $0x3] ss:$9 sm:$0xff] %v947_v43  ;;  %v1011_v17 = vrot.slane %v947_v43, 6  ;;  %v1012_v19 = vrot.slane %v947_v43, 7 }
 0x214   : > { %1079 = vst [vmem:[#allocation1 + $0x4] ss:$9 sm:$0xff] %v1007_v18 }
 0x215   : > { %1080 = vst [vmem:[#allocation1 + $0x5] ss:$9 sm:$0xff] %v1008_v7 }
 0x216   : > { %1081 = vst [vmem:[#allocation1 + $0x6] ss:$9 sm:$0xff] %v1009_v35 }
 0x217   : > { %1082 = vst [vmem:[#allocation1 + $0x7] ss:$9 sm:$0xff] %v1010_v8 }
 0x21e   : > { %v2794_v14 = vld [vmem:[#allocation1] sm:$0xff] }
 0x21f   : > { %3264 = vst [vmem:[#allocation19_spill] sm:$0xff] %v2794_v14  ;;  %v2944_v14 = vld [vmem:[#allocation2 + $0x88] sm:$0x1] }
 0x220   : > { %v950_v23 = vpop.f32.mrf.mxu1  ;;  %1084 = vst [vmem:[#allocation1] ss:$9 sm:$0xff] %v1011_v17 }
 0x221   : > { %v1013_v22 = vrot.slane %v950_v23, 1  ;;  %v1014_v29 = vrot.slane %v950_v23, 2  ;;  %1085 = vst [vmem:[#allocation1 + $0x1] ss:$9 sm:$0xff] %v1012_v19  ;;  %v1015_v28 = vrot.slane %v950_v23, 3  ;;  %v1016_v55 = vrot.slane %v950_v23, 4 }
 0x222   : > { %1086 = vst [vmem:[#allocation1 + $0x2] ss:$9 sm:$0xff] %v950_v23  ;;  %v1017_v3 = vrot.slane %v950_v23, 5  ;;  %v1018_v18 = vrot.slane %v950_v23, 7 }
 0x223   : > { %1087 = vst [vmem:[#allocation1 + $0x3] ss:$9 sm:$0xff] %v1013_v22 }
 0x224   : > { %1088 = vst [vmem:[#allocation1 + $0x4] ss:$9 sm:$0xff] %v1014_v29 }
 0x225   : > { %1089 = vst [vmem:[#allocation1 + $0x5] ss:$9 sm:$0xff] %v1015_v28 }
 0x226   : > { %1090 = vst [vmem:[#allocation1 + $0x6] ss:$9 sm:$0xff] %v1016_v55 }
 0x227   : > { %1091 = vst [vmem:[#allocation1 + $0x7] ss:$9 sm:$0xff] %v1017_v3 }
 0x228   : > { %3270 = vst [vmem:[#allocation25_spill] sm:$0xff] %v2944_v14 }
 0x22e   : > { %v2797_v7 = vld [vmem:[#allocation1] sm:$0xff] }
 0x22f   : > { %v953_v25 = vpop.f32.mrf.mxu1  ;;  %3265 = vst [vmem:[#allocation20_spill] sm:$0xff] %v2797_v7 }
 0x230   : > { %v1019_v43 = vrot.slane %v953_v25, 1  ;;  %v1020_v35 = vrot.slane %v953_v25, 2  ;;  %1093 = vst [vmem:[#allocation1] ss:$9 sm:$0xff] %v1018_v18  ;;  %v1021_v8 = vrot.slane %v953_v25, 3  ;;  %v1022_v12 = vrot.slane %v953_v25, 4 }
 0x231   : > { %1094 = vst [vmem:[#allocation1 + $0x1] ss:$9 sm:$0xff] %v953_v25  ;;  %v1023_v21 = vrot.slane %v953_v25, 5  ;;  %v1024_v17 = vrot.slane %v953_v25, 6  ;;  %v2801_v25 = vld [vmem:[#allocation2 + $0x10] sm:$0xff] }
 0x232   : > { %1095 = vst [vmem:[#allocation1 + $0x2] ss:$9 sm:$0xff] %v1019_v43  ;;  %v3211_v43 = vrot.slane %v2801_v25, 1 }
 0x233   : > { %1096 = vst [vmem:[#allocation1 + $0x3] ss:$9 sm:$0xff] %v1020_v35  ;;  %v3210_v35 = vrot.slane %v2801_v25, 2 }
 0x234   : > { %1097 = vst [vmem:[#allocation1 + $0x4] ss:$9 sm:$0xff] %v1021_v8 }
 0x235   : > { %1098 = vst [vmem:[#allocation1 + $0x5] ss:$9 sm:$0xff] %v1022_v12  ;;  %v3203_v12 = vrot.slane %v2801_v25, 3 }
 0x236   : > { %1099 = vst [vmem:[#allocation1 + $0x6] ss:$9 sm:$0xff] %v1023_v21  ;;  %v3201_v21 = vrot.slane %v2801_v25, 4 }
 0x237   : > { %1100 = vst [vmem:[#allocation1 + $0x7] ss:$9 sm:$0xff] %v1024_v17  ;;  %v3198_v17 = vrot.slane %v2801_v25, 5 }
 0x23e   : > { %v956_v19 = vpop.f32.mrf.mxu1  ;;  %v2799_v23 = vld [vmem:[#allocation1] sm:$0xff] }
 0x23f   : > { %v1025_v22 = vrot.slane %v956_v19, 1  ;;  %v1026_v29 = vrot.slane %v956_v19, 2  ;;  %3266 = vst [vmem:[#allocation21_spill] sm:$0xff] %v2799_v23  ;;  %v1027_v28 = vrot.slane %v956_v19, 3  ;;  %v1028_v55 = vrot.slane %v956_v19, 4 }
 0x240   : > { %1102 = vst [vmem:[#allocation1] ss:$9 sm:$0xff] %v956_v19  ;;  %v1029_v3 = vrot.slane %v956_v19, 5  ;;  %v1030_v18 = vrot.slane %v956_v19, 6  ;;  %v1031_v13 = vrot.slane %v956_v19, 7  ;;  %v3200_v19 = vrot.slane %v2801_v25, 7 }
 0x241   : > { %1103 = vst [vmem:[#allocation1 + $0x1] ss:$9 sm:$0xff] %v1025_v22  ;;  %v2827_v22 = vld [vmem:[#allocation2 + $0x20] sm:$0xff] }
 0x242   : > { %1104 = vst [vmem:[#allocation1 + $0x2] ss:$9 sm:$0xff] %v1026_v29  ;;  %v2829_v29 = vld [vmem:[#allocation2 + $0x18] sm:$0x1] }
 0x243   : > { %1105 = vst [vmem:[#allocation1 + $0x3] ss:$9 sm:$0xff] %v1027_v28  ;;  %v3202_v28 = vrot.slane %v2827_v22, 1 }
 0x244   : > { %1106 = vst [vmem:[#allocation1 + $0x4] ss:$9 sm:$0xff] %v1028_v55  ;;  %v3209_v55 = vrot.slane %v2827_v22, 2 }
 0x245   : > { %1107 = vst [vmem:[#allocation1 + $0x5] ss:$9 sm:$0xff] %v1029_v3 }
 0x246   : > { %1108 = vst [vmem:[#allocation1 + $0x6] ss:$9 sm:$0xff] %v1030_v18  ;;  %v3208_v18 = vrot.slane %v2827_v22, 3 }
 0x247   : > { %1109 = vst [vmem:[#allocation1 + $0x7] ss:$9 sm:$0xff] %v1031_v13  ;;  %v3199_v13 = vrot.slane %v2801_v25, 6 }
 0x24e   : > { %v2805_v8 = vld [vmem:[#allocation1] sm:$0xff] }
 0x24f   : > { %3267 = vst [vmem:[#allocation22_spill] sm:$0xff] %v2805_v8 }
 0x250   : > { %1227 = vst [vmem:[#allocation1] ss:$9 sm:$0xff] %v2801_v25 }
 0x251   : > { %1229 = vst [vmem:[#allocation1 + $0x1] ss:$9 sm:$0xff] %v3211_v43 }
 0x252   : > { %1231 = vst [vmem:[#allocation1 + $0x2] ss:$9 sm:$0xff] %v3210_v35 }
 0x253   : > { %1233 = vst [vmem:[#allocation1 + $0x3] ss:$9 sm:$0xff] %v3203_v12 }
 0x254   : > { %1235 = vst [vmem:[#allocation1 + $0x4] ss:$9 sm:$0xff] %v3201_v21  ;;  %v3205_v21 = vrot.slane %v2827_v22, 7 }
 0x255   : > { %1237 = vst [vmem:[#allocation1 + $0x5] ss:$9 sm:$0xff] %v3198_v17  ;;  %v3207_v17 = vrot.slane %v2827_v22, 4 }
 0x256   : > { %1239 = vst [vmem:[#allocation1 + $0x6] ss:$9 sm:$0xff] %v3199_v13  ;;  %v3206_v13 = vrot.slane %v2827_v22, 5 }
 0x257   : > { %1241 = vst [vmem:[#allocation1 + $0x7] ss:$9 sm:$0xff] %v3200_v19  ;;  %v3204_v19 = vrot.slane %v2827_v22, 6 }
 0x25e   : > { %v1242_v3 = vld [vmem:[#allocation1] sm:$0xff] }
 0x25f   : > { %1243 = vst [vmem:[#allocation1] ss:$9 sm:$0xff] %v2829_v29 }
 0x260   : > { %1244 = vst [vmem:[#allocation1 + $0x1] ss:$9 sm:$0xff] %v2827_v22 }
 0x261   : > { %1245 = vst [vmem:[#allocation1 + $0x2] ss:$9 sm:$0xff] %v3202_v28  ;;  %v2852_v28 = vld [vmem:[#allocation2 + $0x28] sm:$0x1] }
 0x262   : > { %1246 = vst [vmem:[#allocation1 + $0x3] ss:$9 sm:$0xff] %v3209_v55 }
 0x263   : > { %1247 = vst [vmem:[#allocation1 + $0x4] ss:$9 sm:$0xff] %v3208_v18  ;;  %v2922_v18 = vld [vmem:[#allocation2 + $0x80] sm:$0xff] }
 0x264   : > { %1248 = vst [vmem:[#allocation1 + $0x5] ss:$9 sm:$0xff] %v3207_v17  ;;  %v3213_v55 = vrot.slane %v2922_v18, 2  ;;  %v3212_v35 = vrot.slane %v2922_v18, 3  ;;  %v3215_v43 = vrot.slane %v2922_v18, 4  ;;  %v3216_v23 = vrot.slane %v2922_v18, 5 }
 0x265   : > { %1249 = vst [vmem:[#allocation1 + $0x6] ss:$9 sm:$0xff] %v3206_v13  ;;  %v2870_v13 = vld [vmem:[#allocation2 + $0x38] sm:$0x1]  ;;  %v3218_v24 = vrot.slane %v2922_v18, 6  ;;  %v3217_v7 = vrot.slane %v2922_v18, 7 }
 0x266   : > { %1250 = vst [vmem:[#allocation1 + $0x7] ss:$9 sm:$0xff] %v3204_v19  ;;  %v2094_v19 = vld [vmem:[%s3169_s2 + $0x28] sm:$0xff] }
 0x267   : > { %1347 = vmatpush.msra.mxu2 %v2094_v19  ;;  %v2882_v19 = vld [vmem:[#allocation2 + $0x48] sm:$0x1]  ;;  %3269 = vst [vmem:[#allocation24_spill] sm:$0xff] %v2922_v18 }
 0x26d   : > { %v1251_v12 = vld [vmem:[#allocation1] sm:$0xff] }
 0x26e   : > { %1252 = vst [vmem:[#allocation1] ss:$9 sm:$0xff] %v3205_v21  ;;  %v2093_v21 = vld [vmem:[%s3169_s2 + $0x20] sm:$0xff] }
 0x26f   : > { %1253 = vst [vmem:[#allocation1 + $0x1] ss:$9 sm:$0xff] %v2852_v28  ;;  %1348 = vmatpush.msra.mxu2 %v2093_v21 }
 0x270   : > { %1254 = vst [vmem:[#allocation1 + $0x2] ss:$9 sm:$0xff] %v2461_v40  ;;  %2095 = vmatmul.msk.f32.vlgmr.msra.gmra.mxu2 %vm359_vm0, %v1242_v3 }
 0x271   : > { %1255 = vst [vmem:[#allocation1 + $0x3] ss:$9 sm:$0xff] %v2468_v44 }
 0x272   : > { %1256 = vst [vmem:[#allocation1 + $0x4] ss:$9 sm:$0xff] %v2473_v45 }
 0x273   : > { %1257 = vst [vmem:[#allocation1 + $0x5] ss:$9 sm:$0xff] %v2478_v46 }
 0x274   : > { %1258 = vst [vmem:[#allocation1 + $0x6] ss:$9 sm:$0xff] %v2482_v47 }
 0x275   : > { %1259 = vst [vmem:[#allocation1 + $0x7] ss:$9 sm:$0xff] %v2494_v50 }
 0x278   : > { %2096 = vmatmul.msk.f32.gmra.mxu2 %vm359_vm0, %v1251_v12 }
 0x27c   : > { %v1260_v17 = vld [vmem:[#allocation1] sm:$0xff] }
 0x27d   : > { %1261 = vst [vmem:[#allocation1] ss:$9 sm:$0xff] %v2497_v51 }
 0x27e   : > { %1262 = vst [vmem:[#allocation1 + $0x1] ss:$9 sm:$0xff] %v2502_v53 }
 0x27f   : > { %1263 = vst [vmem:[#allocation1 + $0x2] ss:$9 sm:$0xff] %v2870_v13 }
 0x280   : > { %1264 = vst [vmem:[#allocation1 + $0x3] ss:$9 sm:$0xff] %v2499_v52  ;;  %2097 = vmatmul.msk.f32.gmra.mxu2 %vm359_vm0, %v1260_v17  ;;  %v2895_v17 = vld [vmem:[#allocation2 + $0x58] sm:$0x1] }
 0x281   : > { %1265 = vst [vmem:[#allocation1 + $0x4] ss:$9 sm:$0xff] %v2509_v56 }
 0x282   : > { %1266 = vst [vmem:[#allocation1 + $0x5] ss:$9 sm:$0xff] %v2513_v57 }
 0x283   : > { %1267 = vst [vmem:[#allocation1 + $0x6] ss:$9 sm:$0xff] %v2517_v58 }
 0x284   : > { %1268 = vst [vmem:[#allocation1 + $0x7] ss:$9 sm:$0xff] %v2529_v61 }
 0x28b   : > { %v1269_v21 = vld [vmem:[#allocation1] sm:$0xff] }
 0x28c   : > { %1270 = vst [vmem:[#allocation1] ss:$9 sm:$0xff] %v2532_v62  ;;  %2098 = vmatmul.msk.f32.gmra.mxu2 %vm359_vm0, %v1269_v21  ;;  %v2907_v21 = vld [vmem:[#allocation2 + $0x68] sm:$0x1] }
 0x28d   : > { %1271 = vst [vmem:[#allocation1 + $0x1] ss:$9 sm:$0xff] %v2535_v63 }
 0x28e   : > { %1272 = vst [vmem:[#allocation1 + $0x2] ss:$9 sm:$0xff] %v2540_v2 }
 0x28f   : > { %1273 = vst [vmem:[#allocation1 + $0x3] ss:$9 sm:$0xff] %v2882_v19 }
 0x290   : > { %1274 = vst [vmem:[#allocation1 + $0x4] ss:$9 sm:$0xff] %v2537_v1 }
 0x291   : > { %1275 = vst [vmem:[#allocation1 + $0x5] ss:$9 sm:$0xff] %v2548_v4 }
 0x292   : > { %1276 = vst [vmem:[#allocation1 + $0x6] ss:$9 sm:$0xff] %v2552_v5 }
 0x293   : > { %1277 = vst [vmem:[#allocation1 + $0x7] ss:$9 sm:$0xff] %v2562_v15 }
 0x29a   : > { %v1278_v12 = vld [vmem:[#allocation1] sm:$0xff] }
 0x29b   : > { %1279 = vst [vmem:[#allocation1] ss:$9 sm:$0xff] %v2565_v16  ;;  %2099 = vmatmul.msk.f32.gmra.mxu2 %vm359_vm0, %v1278_v12 }
 0x29c   : > { %1280 = vst [vmem:[#allocation1 + $0x1] ss:$9 sm:$0xff] %v2568_v20 }
 0x29d   : > { %1281 = vst [vmem:[#allocation1 + $0x2] ss:$9 sm:$0xff] %v2571_v27 }
 0x29e   : > { %1282 = vst [vmem:[#allocation1 + $0x3] ss:$9 sm:$0xff] %v2577_v37 }
 0x29f   : > { %1283 = vst [vmem:[#allocation1 + $0x4] ss:$9 sm:$0xff] %v2895_v17 }
 0x2a0   : > { %1284 = vst [vmem:[#allocation1 + $0x5] ss:$9 sm:$0xff] %v2574_v31 }
 0x2a1   : > { %1285 = vst [vmem:[#allocation1 + $0x6] ss:$9 sm:$0xff] %v2585_v42 }
 0x2a2   : > { %1286 = vst [vmem:[#allocation1 + $0x7] ss:$9 sm:$0xff] %v2593_v48 }
 0x2a9   : > { %v1287_v3 = vld [vmem:[#allocation1] sm:$0xff] }
 0x2aa   : > { %1288 = vst [vmem:[#allocation1] ss:$9 sm:$0xff] %v2596_v49  ;;  %2100 = vmatmul.msk.f32.gmra.mxu2 %vm359_vm0, %v1287_v3  ;;  %v2919_v3 = vld [vmem:[#allocation2 + $0x78] sm:$0x1] }
 0x2ab   : > { %1289 = vst [vmem:[#allocation1 + $0x1] ss:$9 sm:$0xff] %v2599_v54 }
 0x2ac   : > { %1290 = vst [vmem:[#allocation1 + $0x2] ss:$9 sm:$0xff] %v2602_v60 }
 0x2ad   : > { %1291 = vst [vmem:[#allocation1 + $0x3] ss:$9 sm:$0xff] %v2606_v0 }
 0x2ae   : > { %1292 = vst [vmem:[#allocation1 + $0x4] ss:$9 sm:$0xff] %v2610_v6 }
 0x2af   : > { %1293 = vst [vmem:[#allocation1 + $0x5] ss:$9 sm:$0xff] %v2907_v21 }
 0x2b0   : > { %1294 = vst [vmem:[#allocation1 + $0x6] ss:$9 sm:$0xff] %v2617_v41 }
 0x2b1   : > { %1295 = vst [vmem:[#allocation1 + $0x7] ss:$9 sm:$0xff] %v2624_v59 }
 0x2b2   : > { %3268 = vst [vmem:[#allocation23_spill] sm:$0xff] %v2919_v3 }
 0x2b8   : > { %v1296_v12 = vld [vmem:[#allocation1] sm:$0xff] }
 0x2b9   : > { %1297 = vst [vmem:[#allocation1] ss:$9 sm:$0xff] %v2627_v39  ;;  %2101 = vmatmul.msk.f32.gmra.mxu2 %vm359_vm0, %v1296_v12  ;;  %v3214_v12 = vrot.slane %v2922_v18, 1 }
 0x2ba   : > { %1298 = vst [vmem:[#allocation1 + $0x1] ss:$9 sm:$0xff] %v2630_v36 }
 0x2bb   : > { %1299 = vst [vmem:[#allocation1 + $0x2] ss:$9 sm:$0xff] %v2633_v34 }
 0x2bc   : > { %1300 = vst [vmem:[#allocation1 + $0x3] ss:$9 sm:$0xff] %v2637_v33 }
 0x2bd   : > { %1301 = vst [vmem:[#allocation1 + $0x4] ss:$9 sm:$0xff] %v3257_v38 }
 0x2be   : > { %1302 = vst [vmem:[#allocation1 + $0x5] ss:$9 sm:$0xff] %v3258_v9 }
 0x2bf   : > { %1303 = vst [vmem:[#allocation1 + $0x6] ss:$9 sm:$0xff] %v2919_v3 }
 0x2c0   : > { %1304 = vst [vmem:[#allocation1 + $0x7] ss:$9 sm:$0xff] %v2922_v18 }
 0x2c7   : > { %v1305_v8 = vld [vmem:[#allocation1] sm:$0xff] }
 0x2c8   : > { %1306 = vst [vmem:[#allocation1] ss:$9 sm:$0xff] %v3214_v12  ;;  %2102 = vmatmul.msk.f32.gmra.mxu2 %vm359_vm0, %v1305_v8 }
 0x2c9   : > { %1307 = vst [vmem:[#allocation1 + $0x1] ss:$9 sm:$0xff] %v3213_v55 }
 0x2ca   : > { %1308 = vst [vmem:[#allocation1 + $0x2] ss:$9 sm:$0xff] %v3212_v35 }
 0x2cb   : > { %1309 = vst [vmem:[#allocation1 + $0x3] ss:$9 sm:$0xff] %v3215_v43 }
 0x2cc   : > { %1310 = vst [vmem:[#allocation1 + $0x4] ss:$9 sm:$0xff] %v3216_v23 }
 0x2cd   : > { %1311 = vst [vmem:[#allocation1 + $0x5] ss:$9 sm:$0xff] %v3218_v24 }
 0x2ce   : > { %1312 = vst [vmem:[#allocation1 + $0x6] ss:$9 sm:$0xff] %v3217_v7 }
 0x2cf   : > { %1313 = vst [vmem:[#allocation1 + $0x7] ss:$9 sm:$0xff] %v2944_v14 }
 0x2d6   : > { %v1314_v8 = vld [vmem:[#allocation1] sm:$0xff] }
 0x2d7   : > { %2103 = vmatmul.msk.f32.gmra.mxu2 %vm359_vm0, %v1314_v8 }
 0x2f3   : > { %v1350_v35 = vpop.f32.mrf.mxu2 }
 0x2f4   : > { %v1394_v55 = vrot.slane %v1350_v35, 1  ;;  %v1395_v12 = vrot.slane %v1350_v35, 2  ;;  %v1396_v43 = vrot.slane %v1350_v35, 3  ;;  %1450 = vst [vmem:[#allocation1] ss:$9 sm:$0xff] %v1350_v35  ;;  %v1397_v26 = vrot.slane %v1350_v35, 4 }
 0x2f5   : > { %v1398_v30 = vrot.slane %v1350_v35, 5  ;;  %v1399_v23 = vrot.slane %v1350_v35, 6  ;;  %v1400_v11 = vrot.slane %v1350_v35, 7 }
 0x2f6   : > { %1452 = vst [vmem:[#allocation1 + $0x1] ss:$9 sm:$0xff] %v1394_v55 }
 0x2f7   : > { %1454 = vst [vmem:[#allocation1 + $0x2] ss:$9 sm:$0xff] %v1395_v12 }
 0x2f8   : > { %1456 = vst [vmem:[#allocation1 + $0x3] ss:$9 sm:$0xff] %v1396_v43 }
 0x2f9   : > { %1458 = vst [vmem:[#allocation1 + $0x4] ss:$9 sm:$0xff] %v1397_v26 }
 0x2fa   : > { %1460 = vst [vmem:[#allocation1 + $0x5] ss:$9 sm:$0xff] %v1398_v30 }
 0x2fb   : > { %1462 = vst [vmem:[#allocation1 + $0x6] ss:$9 sm:$0xff] %v1399_v23  ;;  %v1353_v7 = vpop.f32.mrf.mxu2 }
 0x2fc   : > { %1464 = vst [vmem:[#allocation1 + $0x7] ss:$9 sm:$0xff] %v1400_v11  ;;  %v1401_v24 = vrot.slane %v1353_v7, 1  ;;  %v1402_v32 = vrot.slane %v1353_v7, 2  ;;  %v1403_v8 = vrot.slane %v1353_v7, 3  ;;  %v1404_v14 = vrot.slane %v1353_v7, 4 }
 0x2fd   : > { %v1405_v18 = vrot.slane %v1353_v7, 5  ;;  %v1406_v3 = vrot.slane %v1353_v7, 6  ;;  %v1407_v55 = vrot.slane %v1353_v7, 7 }
 0x303   : > { %v2954_v10 = vld [vmem:[#allocation1] sm:$0xff]  ;;  %v1356_v43 = vpop.f32.mrf.mxu2 }
 0x304   : > { %1466 = vst [vmem:[#allocation1] ss:$9 sm:$0xff] %v1401_v24  ;;  %v1408_v11 = vrot.slane %v1356_v43, 2  ;;  %v1409_v30 = vrot.slane %v1356_v43, 3  ;;  %v1410_v23 = vrot.slane %v1356_v43, 4  ;;  %v1411_v12 = vrot.slane %v1356_v43, 5 }
 0x305   : > { %1467 = vst [vmem:[#allocation1 + $0x1] ss:$9 sm:$0xff] %v1402_v32  ;;  %v1412_v24 = vrot.slane %v1356_v43, 6  ;;  %v1413_v32 = vrot.slane %v1356_v43, 7 }
 0x306   : > { %1468 = vst [vmem:[#allocation1 + $0x2] ss:$9 sm:$0xff] %v1403_v8 }
 0x307   : > { %1469 = vst [vmem:[#allocation1 + $0x3] ss:$9 sm:$0xff] %v1404_v14 }
 0x308   : > { %1470 = vst [vmem:[#allocation1 + $0x4] ss:$9 sm:$0xff] %v1405_v18 }
 0x309   : > { %1471 = vst [vmem:[#allocation1 + $0x5] ss:$9 sm:$0xff] %v1406_v3 }
 0x30a   : > { %1472 = vst [vmem:[#allocation1 + $0x6] ss:$9 sm:$0xff] %v1407_v55 }
 0x30b   : > { %1473 = vst [vmem:[#allocation1 + $0x7] ss:$9 sm:$0xff] %v1356_v43 }
 0x30f   : > { %v1359_v35 = vpop.f32.mrf.mxu2 }
 0x310   : > { %v1414_v7 = vrot.slane %v1359_v35, 1  ;;  %v1415_v14 = vrot.slane %v1359_v35, 3  ;;  %v1416_v18 = vrot.slane %v1359_v35, 4  ;;  %v1417_v55 = vrot.slane %v1359_v35, 5 }
 0x312   : > { %v2956_v26 = vld [vmem:[#allocation1] sm:$0xff] }
 0x313   : > { %3271 = vst [vmem:[#allocation26_spill] sm:$0xff] %v2956_v26  ;;  %v1419_v26 = vrot.slane %v1359_v35, 7 }
 0x314   : > { %1475 = vst [vmem:[#allocation1] ss:$9 sm:$0xff] %v1408_v11  ;;  %v1418_v11 = vrot.slane %v1359_v35, 6 }
 0x315   : > { %1476 = vst [vmem:[#allocation1 + $0x1] ss:$9 sm:$0xff] %v1409_v30 }
 0x316   : > { %1477 = vst [vmem:[#allocation1 + $0x2] ss:$9 sm:$0xff] %v1410_v23 }
 0x317   : > { %1478 = vst [vmem:[#allocation1 + $0x3] ss:$9 sm:$0xff] %v1411_v12 }
 0x318   : > { %1479 = vst [vmem:[#allocation1 + $0x4] ss:$9 sm:$0xff] %v1412_v24 }
 0x319   : > { %1480 = vst [vmem:[#allocation1 + $0x5] ss:$9 sm:$0xff] %v1413_v32 }
 0x31a   : > { %1481 = vst [vmem:[#allocation1 + $0x6] ss:$9 sm:$0xff] %v1359_v35 }
 0x31b   : > { %1482 = vst [vmem:[#allocation1 + $0x7] ss:$9 sm:$0xff] %v1414_v7 }
 0x31e   : > { %v1362_v8 = vpop.f32.mrf.mxu2 }
 0x31f   : > { %v1420_v30 = vrot.slane %v1362_v8, 1  ;;  %v1421_v43 = vrot.slane %v1362_v8, 2  ;;  %v1422_v23 = vrot.slane %v1362_v8, 4  ;;  %v1423_v24 = vrot.slane %v1362_v8, 5 }
 0x320   : > { %v1424_v7 = vrot.slane %v1362_v8, 6 }
 0x322   : > { %v2958_v3 = vld [vmem:[#allocation1] sm:$0xff] }
 0x323   : > { %3272 = vst [vmem:[#allocation27_spill] sm:$0xff] %v2958_v3  ;;  %v1425_v3 = vrot.slane %v1362_v8, 7 }
 0x324   : > { %1484 = vst [vmem:[#allocation1] ss:$9 sm:$0xff] %v1415_v14 }
 0x325   : > { %1485 = vst [vmem:[#allocation1 + $0x1] ss:$9 sm:$0xff] %v1416_v18 }
 0x326   : > { %1486 = vst [vmem:[#allocation1 + $0x2] ss:$9 sm:$0xff] %v1417_v55 }
 0x327   : > { %1487 = vst [vmem:[#allocation1 + $0x3] ss:$9 sm:$0xff] %v1418_v11 }
 0x328   : > { %1488 = vst [vmem:[#allocation1 + $0x4] ss:$9 sm:$0xff] %v1419_v26 }
 0x329   : > { %1489 = vst [vmem:[#allocation1 + $0x5] ss:$9 sm:$0xff] %v1362_v8 }
 0x32a   : > { %1490 = vst [vmem:[#allocation1 + $0x6] ss:$9 sm:$0xff] %v1420_v30 }
 0x32b   : > { %1491 = vst [vmem:[#allocation1 + $0x7] ss:$9 sm:$0xff] %v1421_v43 }
 0x32d   : > { %v1365_v12 = vpop.f32.mrf.mxu2 }
 0x32e   : > { %v1426_v14 = vrot.slane %v1365_v12, 1  ;;  %v1427_v35 = vrot.slane %v1365_v12, 2  ;;  %v1428_v18 = vrot.slane %v1365_v12, 3  ;;  %v1429_v55 = vrot.slane %v1365_v12, 5 }
 0x32f   : > { %v1430_v11 = vrot.slane %v1365_v12, 6  ;;  %v1431_v43 = vrot.slane %v1365_v12, 7 }
 0x332   : > { %v2960_v32 = vld [vmem:[#allocation1] sm:$0xff] }
 0x333   : > { %3273 = vst [vmem:[#allocation28_spill] sm:$0xff] %v2960_v32 }
 0x334   : > { %1493 = vst [vmem:[#allocation1] ss:$9 sm:$0xff] %v1422_v23 }
 0x335   : > { %1494 = vst [vmem:[#allocation1 + $0x1] ss:$9 sm:$0xff] %v1423_v24 }
 0x336   : > { %1495 = vst [vmem:[#allocation1 + $0x2] ss:$9 sm:$0xff] %v1424_v7 }
 0x337   : > { %1496 = vst [vmem:[#allocation1 + $0x3] ss:$9 sm:$0xff] %v1425_v3 }
 0x338   : > { %1497 = vst [vmem:[#allocation1 + $0x4] ss:$9 sm:$0xff] %v1365_v12 }
 0x339   : > { %1498 = vst [vmem:[#allocation1 + $0x5] ss:$9 sm:$0xff] %v1426_v14 }
 0x33a   : > { %1499 = vst [vmem:[#allocation1 + $0x6] ss:$9 sm:$0xff] %v1427_v35 }
 0x33b   : > { %1500 = vst [vmem:[#allocation1 + $0x7] ss:$9 sm:$0xff] %v1428_v18 }
 0x33c   : > { %v1368_v26 = vpop.f32.mrf.mxu2 }
 0x33d   : > { %v1432_v32 = vrot.slane %v1368_v26, 1  ;;  %v1433_v8 = vrot.slane %v1368_v26, 2  ;;  %v1434_v23 = vrot.slane %v1368_v26, 3  ;;  %v1435_v24 = vrot.slane %v1368_v26, 4 }
 0x33e   : > { %v1436_v7 = vrot.slane %v1368_v26, 6  ;;  %v1437_v14 = vrot.slane %v1368_v26, 7 }
 0x342   : > { %v2962_v30 = vld [vmem:[#allocation1] sm:$0xff] }
 0x343   : > { %3274 = vst [vmem:[#allocation29_spill] sm:$0xff] %v2962_v30 }
 0x344   : > { %1502 = vst [vmem:[#allocation1] ss:$9 sm:$0xff] %v1429_v55 }
 0x345   : > { %1503 = vst [vmem:[#allocation1 + $0x1] ss:$9 sm:$0xff] %v1430_v11 }
 0x346   : > { %1504 = vst [vmem:[#allocation1 + $0x2] ss:$9 sm:$0xff] %v1431_v43 }
 0x347   : > { %1505 = vst [vmem:[#allocation1 + $0x3] ss:$9 sm:$0xff] %v1368_v26 }
 0x348   : > { %1506 = vst [vmem:[#allocation1 + $0x4] ss:$9 sm:$0xff] %v1432_v32 }
 0x349   : > { %1507 = vst [vmem:[#allocation1 + $0x5] ss:$9 sm:$0xff] %v1433_v8 }
 0x34a   : > { %1508 = vst [vmem:[#allocation1 + $0x6] ss:$9 sm:$0xff] %v1434_v23 }
 0x34b   : > { %1509 = vst [vmem:[#allocation1 + $0x7] ss:$9 sm:$0xff] %v1435_v24  ;;  %v1371_v3 = vpop.f32.mrf.mxu2 }
 0x34c   : > { %v1438_v18 = vrot.slane %v1371_v3, 1  ;;  %v1439_v12 = vrot.slane %v1371_v3, 2  ;;  %v1440_v55 = vrot.slane %v1371_v3, 3  ;;  %v1441_v11 = vrot.slane %v1371_v3, 4 }
 0x34d   : > { %v1442_v43 = vrot.slane %v1371_v3, 5  ;;  %v1443_v8 = vrot.slane %v1371_v3, 7 }
 0x352   : > { %v2964_v35 = vld [vmem:[#allocation1] sm:$0xff] }
 0x353   : > { %3275 = vst [vmem:[#allocation30_spill] sm:$0xff] %v2964_v35 }
 0x354   : > { %1511 = vst [vmem:[#allocation1] ss:$9 sm:$0xff] %v1436_v7 }
 0x355   : > { %1512 = vst [vmem:[#allocation1 + $0x1] ss:$9 sm:$0xff] %v1437_v14 }
 0x356   : > { %1513 = vst [vmem:[#allocation1 + $0x2] ss:$9 sm:$0xff] %v1371_v3  ;;  %v2105_v3 = vld [vmem:[%s3169_s2 + $0x38] sm:$0xff] }
 0x357   : > { %1514 = vst [vmem:[#allocation1 + $0x3] ss:$9 sm:$0xff] %v1438_v18  ;;  %1676 = vmatpush.msra.mxu3 %v2105_v3  ;;  %v3286_v3 = vrot.slane %v2827_v22, 4 }
 0x358   : > { %1515 = vst [vmem:[#allocation1 + $0x4] ss:$9 sm:$0xff] %v1439_v12  ;;  %v3276_v12 = vrot.slane %v2801_v25, 1 }
 0x359   : > { %1516 = vst [vmem:[#allocation1 + $0x5] ss:$9 sm:$0xff] %v1440_v55  ;;  %v3277_v55 = vrot.slane %v2801_v25, 2 }
 0x35a   : > { %1517 = vst [vmem:[#allocation1 + $0x6] ss:$9 sm:$0xff] %v1441_v11  ;;  %v1374_v32 = vpop.f32.mrf.mxu2  ;;  %v3279_v11 = vrot.slane %v2801_v25, 4 }
 0x35b   : > { %1518 = vst [vmem:[#allocation1 + $0x7] ss:$9 sm:$0xff] %v1442_v43  ;;  %v1444_v23 = vrot.slane %v1374_v32, 1  ;;  %v1445_v26 = vrot.slane %v1374_v32, 2  ;;  %v1446_v35 = vrot.slane %v1374_v32, 3  ;;  %v1447_v7 = vrot.slane %v1374_v32, 4 }
 0x35c   : > { %v1448_v14 = vrot.slane %v1374_v32, 5  ;;  %v1449_v30 = vrot.slane %v1374_v32, 6  ;;  %v3280_v43 = vrot.slane %v2801_v25, 5 }
 0x362   : > { %v2966_v24 = vld [vmem:[#allocation1] sm:$0xff] }
 0x363   : > { %1520 = vst [vmem:[#allocation1] ss:$9 sm:$0xff] %v1443_v8  ;;  %v3282_v8 = vrot.slane %v2801_v25, 7 }
 0x364   : > { %1521 = vst [vmem:[#allocation1 + $0x1] ss:$9 sm:$0xff] %v1374_v32  ;;  %v3281_v32 = vrot.slane %v2801_v25, 6 }
 0x365   : > { %1522 = vst [vmem:[#allocation1 + $0x2] ss:$9 sm:$0xff] %v1444_v23 }
 0x366   : > { %1523 = vst [vmem:[#allocation1 + $0x3] ss:$9 sm:$0xff] %v1445_v26  ;;  %v3283_v26 = vrot.slane %v2827_v22, 1 }
 0x367   : > { %1524 = vst [vmem:[#allocation1 + $0x4] ss:$9 sm:$0xff] %v1446_v35  ;;  %v2104_v35 = vld [vmem:[%s3169_s2 + $0x30] sm:$0xff] }
 0x368   : > { %1525 = vst [vmem:[#allocation1 + $0x5] ss:$9 sm:$0xff] %v1447_v7  ;;  %1677 = vmatpush.msra.mxu3 %v2104_v35  ;;  %v3284_v7 = vrot.slane %v2827_v22, 2 }
 0x369   : > { %1526 = vst [vmem:[#allocation1 + $0x6] ss:$9 sm:$0xff] %v1448_v14  ;;  %v3285_v14 = vrot.slane %v2827_v22, 3 }
 0x36a   : > { %1527 = vst [vmem:[#allocation1 + $0x7] ss:$9 sm:$0xff] %v1449_v30  ;;  %v3278_v30 = vrot.slane %v2801_v25, 3 }
 0x371   : > { %v2968_v18 = vld [vmem:[#allocation1] sm:$0xff] }
 0x372   : > { %1556 = vst [vmem:[#allocation1] ss:$9 sm:$0xff] %v2801_v25  ;;  %v3287_v25 = vrot.slane %v2827_v22, 5 }
 0x373   : > { %1558 = vst [vmem:[#allocation1 + $0x1] ss:$9 sm:$0xff] %v3276_v12 }
 0x374   : > { %1560 = vst [vmem:[#allocation1 + $0x2] ss:$9 sm:$0xff] %v3277_v55  ;;  %v3289_v55 = vrot.slane %v2827_v22, 7 }
 0x375   : > { %1562 = vst [vmem:[#allocation1 + $0x3] ss:$9 sm:$0xff] %v3278_v30 }
 0x376   : > { %1564 = vst [vmem:[#allocation1 + $0x4] ss:$9 sm:$0xff] %v3279_v11 }
 0x377   : > { %1566 = vst [vmem:[#allocation1 + $0x5] ss:$9 sm:$0xff] %v3280_v43 }
 0x378   : > { %1568 = vst [vmem:[#allocation1 + $0x6] ss:$9 sm:$0xff] %v3281_v32  ;;  %v3302_v32 = vld [vmem:[#allocation11_spill] sm:$0xff] }
 0x379   : > { %1570 = vst [vmem:[#allocation1 + $0x7] ss:$9 sm:$0xff] %v3282_v8  ;;  %v3303_v8 = vld [vmem:[#allocation8_spill] sm:$0xff] }
 0x380   : > { %v1571_v23 = vld [vmem:[#allocation1] sm:$0xff] }
 0x381   : > { %1572 = vst [vmem:[#allocation1] ss:$9 sm:$0xff] %v2829_v29  ;;  %2106 = vmatmul.msk.f32.vlgmr.msra.gmra.mxu3 %vm359_vm0, %v1571_v23  ;;  %v3288_v29 = vrot.slane %v2827_v22, 6  ;;  %v1120_v23 = vadd.f32 %v3303_v8, %v3302_v32  ;;  %v3316_v32 = vld [vmem:[#allocation30_spill] sm:$0xff] }
 0x382   : > { %1573 = vst [vmem:[#allocation1 + $0x1] ss:$9 sm:$0xff] %v2827_v22 }
 0x383   : > { %1574 = vst [vmem:[#allocation1 + $0x2] ss:$9 sm:$0xff] %v3283_v26  ;;  %v3304_v26 = vld [vmem:[#allocation26_spill] sm:$0xff] }
 0x384   : > { %1575 = vst [vmem:[#allocation1 + $0x3] ss:$9 sm:$0xff] %v3284_v7  ;;  %v1538_v7 = vadd.f32 %v3304_v26, %v1120_v23 }
 0x385   : > { %1576 = vst [vmem:[#allocation1 + $0x4] ss:$9 sm:$0xff] %v3285_v14 }
 0x386   : > { %1577 = vst [vmem:[#allocation1 + $0x5] ss:$9 sm:$0xff] %v3286_v3 }
 0x387   : > { %1578 = vst [vmem:[#allocation1 + $0x6] ss:$9 sm:$0xff] %v3287_v25 }
 0x388   : > { %1579 = vst [vmem:[#allocation1 + $0x7] ss:$9 sm:$0xff] %v3288_v29 }
 0x38f   : > { %v1580_v12 = vld [vmem:[#allocation1] sm:$0xff] }
 0x390   : > { %1581 = vst [vmem:[#allocation1] ss:$9 sm:$0xff] %v3289_v55  ;;  %2107 = vmatmul.msk.f32.gmra.mxu3 %vm359_vm0, %v1580_v12  ;;  %v3305_v55 = vld [vmem:[#allocation12_spill] sm:$0xff] }
 0x391   : > { %1582 = vst [vmem:[#allocation1 + $0x1] ss:$9 sm:$0xff] %v2852_v28 }
 0x392   : > { %1583 = vst [vmem:[#allocation1 + $0x2] ss:$9 sm:$0xff] %v2461_v40 }
 0x393   : > { %1584 = vst [vmem:[#allocation1 + $0x3] ss:$9 sm:$0xff] %v2468_v44 }
 0x394   : > { %1585 = vst [vmem:[#allocation1 + $0x4] ss:$9 sm:$0xff] %v2473_v45 }
 0x395   : > { %1586 = vst [vmem:[#allocation1 + $0x5] ss:$9 sm:$0xff] %v2478_v46 }
 0x396   : > { %1587 = vst [vmem:[#allocation1 + $0x6] ss:$9 sm:$0xff] %v2482_v47  ;;  %v3290_v47 = vld [vmem:[#allocation23_spill] sm:$0xff] }
 0x397   : > { %1588 = vst [vmem:[#allocation1 + $0x7] ss:$9 sm:$0xff] %v2494_v50 }
 0x39e   : > { %v1589_v35 = vld [vmem:[#allocation1] sm:$0xff] }
 0x39f   : > { %1590 = vst [vmem:[#allocation1] ss:$9 sm:$0xff] %v2497_v51  ;;  %2108 = vmatmul.msk.f32.gmra.mxu3 %vm359_vm0, %v1589_v35  ;;  %v3306_v35 = vld [vmem:[#allocation9_spill] sm:$0xff] }
 0x3a0   : > { %1591 = vst [vmem:[#allocation1 + $0x1] ss:$9 sm:$0xff] %v2502_v53 }
 0x3a1   : > { %1592 = vst [vmem:[#allocation1 + $0x2] ss:$9 sm:$0xff] %v2870_v13 }
 0x3a2   : > { %1593 = vst [vmem:[#allocation1 + $0x3] ss:$9 sm:$0xff] %v2499_v52 }
 0x3a3   : > { %1594 = vst [vmem:[#allocation1 + $0x4] ss:$9 sm:$0xff] %v2509_v56  ;;  %v3299_v56 = vld [vmem:[#allocation25_spill] sm:$0xff] }
 0x3a4   : > { %1595 = vst [vmem:[#allocation1 + $0x5] ss:$9 sm:$0xff] %v2513_v57 }
 0x3a5   : > { %1596 = vst [vmem:[#allocation1 + $0x6] ss:$9 sm:$0xff] %v2517_v58 }
 0x3a6   : > { %1597 = vst [vmem:[#allocation1 + $0x7] ss:$9 sm:$0xff] %v2529_v61 }
 0x3ad   : > { %v1598_v40 = vld [vmem:[#allocation1] sm:$0xff] }
 0x3ae   : > { %2109 = vmatmul.msk.f32.gmra.mxu3 %vm359_vm0, %v1598_v40  ;;  %1599 = vst [vmem:[#allocation1] ss:$9 sm:$0xff] %v2532_v62  ;;  %v1121_v40 = vadd.f32 %v3306_v35, %v3305_v55  ;;  %v3317_v35 = vld [vmem:[#allocation16_spill] sm:$0xff] }
 0x3af   : > { %1600 = vst [vmem:[#allocation1 + $0x1] ss:$9 sm:$0xff] %v2535_v63 }
 0x3b0   : > { %1601 = vst [vmem:[#allocation1 + $0x2] ss:$9 sm:$0xff] %v2540_v2 }
 0x3b1   : > { %1602 = vst [vmem:[#allocation1 + $0x3] ss:$9 sm:$0xff] %v2882_v19 }
 0x3b2   : > { %1603 = vst [vmem:[#allocation1 + $0x4] ss:$9 sm:$0xff] %v2537_v1 }
 0x3b3   : > { %1604 = vst [vmem:[#allocation1 + $0x5] ss:$9 sm:$0xff] %v2548_v4 }
 0x3b4   : > { %1605 = vst [vmem:[#allocation1 + $0x6] ss:$9 sm:$0xff] %v2552_v5 }
 0x3b5   : > { %1606 = vst [vmem:[#allocation1 + $0x7] ss:$9 sm:$0xff] %v2562_v15 }
 0x3bc   : > { %v1607_v44 = vld [vmem:[#allocation1] sm:$0xff] }
 0x3bd   : > { %2110 = vmatmul.msk.f32.gmra.mxu3 %vm359_vm0, %v1607_v44  ;;  %1608 = vst [vmem:[#allocation1] ss:$9 sm:$0xff] %v2565_v16 }
 0x3be   : > { %1609 = vst [vmem:[#allocation1 + $0x1] ss:$9 sm:$0xff] %v2568_v20 }
 0x3bf   : > { %1610 = vst [vmem:[#allocation1 + $0x2] ss:$9 sm:$0xff] %v2571_v27 }
 0x3c0   : > { %1611 = vst [vmem:[#allocation1 + $0x3] ss:$9 sm:$0xff] %v2577_v37 }
 0x3c1   : > { %1612 = vst [vmem:[#allocation1 + $0x4] ss:$9 sm:$0xff] %v2895_v17  ;;  %v3085_v17 = vld [vmem:[%s3170_s3] ss:$0 sm:$0xff] }
 0x3c2   : > { %1613 = vst [vmem:[#allocation1 + $0x5] ss:$9 sm:$0xff] %v2574_v31 }
 0x3c3   : > { %1614 = vst [vmem:[#allocation1 + $0x6] ss:$9 sm:$0xff] %v2585_v42 }
 0x3c4   : > { %1615 = vst [vmem:[#allocation1 + $0x7] ss:$9 sm:$0xff] %v2593_v48 }
 0x3cb   : > { %v1616_v45 = vld [vmem:[#allocation1] sm:$0xff] }
 0x3cc   : > { %2111 = vmatmul.msk.f32.gmra.mxu3 %vm359_vm0, %v1616_v45  ;;  %1617 = vst [vmem:[#allocation1] ss:$9 sm:$0xff] %v2596_v49 }
 0x3cd   : > { %1618 = vst [vmem:[#allocation1 + $0x1] ss:$9 sm:$0xff] %v2599_v54 }
 0x3ce   : > { %1619 = vst [vmem:[#allocation1 + $0x2] ss:$9 sm:$0xff] %v2602_v60  ;;  %v3300_v60 = vld [vmem:[#allocation10_spill] sm:$0xff] }
 0x3cf   : > { %1620 = vst [vmem:[#allocation1 + $0x3] ss:$9 sm:$0xff] %v2606_v0  ;;  %v3301_v0 = vld [vmem:[#allocation7_spill] sm:$0xff] }
 0x3d0   : > { %1621 = vst [vmem:[#allocation1 + $0x4] ss:$9 sm:$0xff] %v2610_v6  ;;  %v1119_v6 = vadd.f32 %v3301_v0, %v3300_v60 }
 0x3d1   : > { %1622 = vst [vmem:[#allocation1 + $0x5] ss:$9 sm:$0xff] %v2907_v21 }
 0x3d2   : > { %1623 = vst [vmem:[#allocation1 + $0x6] ss:$9 sm:$0xff] %v2617_v41  ;;  %v3291_v41 = vld [vmem:[#allocation24_spill] sm:$0xff] }
 0x3d3   : > { %1624 = vst [vmem:[#allocation1 + $0x7] ss:$9 sm:$0xff] %v2624_v59  ;;  %v3292_v51 = vrot.slane %v3291_v41, 1  ;;  %v3297_v52 = vrot.slane %v3291_v41, 6  ;;  %v3298_v53 = vrot.slane %v3291_v41, 7 }
 0x3da   : > { %v1625_v46 = vld [vmem:[#allocation1] sm:$0xff] }
 0x3db   : > { %2112 = vmatmul.msk.f32.gmra.mxu3 %vm359_vm0, %v1625_v46  ;;  %1626 = vst [vmem:[#allocation1] ss:$9 sm:$0xff] %v2627_v39  ;;  %v3296_v39 = vrot.slane %v3291_v41, 5 }
 0x3dc   : > { %1627 = vst [vmem:[#allocation1 + $0x1] ss:$9 sm:$0xff] %v2630_v36  ;;  %v3293_v36 = vrot.slane %v3291_v41, 2 }
 0x3dd   : > { %1628 = vst [vmem:[#allocation1 + $0x2] ss:$9 sm:$0xff] %v2633_v34  ;;  %v3294_v34 = vrot.slane %v3291_v41, 3 }
 0x3de   : > { %1629 = vst [vmem:[#allocation1 + $0x3] ss:$9 sm:$0xff] %v2637_v33  ;;  %v3295_v33 = vrot.slane %v3291_v41, 4 }
 0x3df   : > { %1630 = vst [vmem:[#allocation1 + $0x4] ss:$9 sm:$0xff] %v3257_v38  ;;  %v1537_v38 = vadd.f32 %v2954_v10, %v1119_v6 }
 0x3e0   : > { %1631 = vst [vmem:[#allocation1 + $0x5] ss:$9 sm:$0xff] %v3258_v9 }
 0x3e1   : > { %1632 = vst [vmem:[#allocation1 + $0x6] ss:$9 sm:$0xff] %v3290_v47 }
 0x3e2   : > { %1633 = vst [vmem:[#allocation1 + $0x7] ss:$9 sm:$0xff] %v3291_v41  ;;  %v3307_v41 = vld [vmem:[#allocation27_spill] sm:$0xff] }
 0x3e9   : > { %v1634_v50 = vld [vmem:[#allocation1] sm:$0xff] }
 0x3ea   : > { %2113 = vmatmul.msk.f32.gmra.mxu3 %vm359_vm0, %v1634_v50  ;;  %1635 = vst [vmem:[#allocation1] ss:$9 sm:$0xff] %v3292_v51  ;;  %v1539_v50 = vadd.f32 %v3307_v41, %v1121_v40  ;;  %v3318_v40 = vld [vmem:[#allocation21_spill] sm:$0xff] }
 0x3eb   : > { %1636 = vst [vmem:[#allocation1 + $0x1] ss:$9 sm:$0xff] %v3293_v36 }
 0x3ec   : > { %1637 = vst [vmem:[#allocation1 + $0x2] ss:$9 sm:$0xff] %v3294_v34 }
 0x3ed   : > { %1638 = vst [vmem:[#allocation1 + $0x3] ss:$9 sm:$0xff] %v3295_v33 }
 0x3ee   : > { %1639 = vst [vmem:[#allocation1 + $0x4] ss:$9 sm:$0xff] %v3296_v39  ;;  %v3308_v39 = vld [vmem:[#allocation13_spill] sm:$0xff] }
 0x3ef   : > { %1640 = vst [vmem:[#allocation1 + $0x5] ss:$9 sm:$0xff] %v3297_v52  ;;  %v3309_v52 = vld [vmem:[#allocation18_spill] sm:$0xff] }
 0x3f0   : > { %1641 = vst [vmem:[#allocation1 + $0x6] ss:$9 sm:$0xff] %v3298_v53  ;;  %v1122_v53 = vadd.f32 %v3309_v52, %v3308_v39 }
 0x3f1   : > { %1642 = vst [vmem:[#allocation1 + $0x7] ss:$9 sm:$0xff] %v3299_v56 }
 0x3f8   : > { %v1643_v57 = vld [vmem:[#allocation1] sm:$0xff] }
 0x3f9   : > { %2114 = vmatmul.msk.f32.gmra.mxu3 %vm359_vm0, %v1643_v57 }
 0x404   : > { %v1679_v58 = vpop.f32.mrf.mxu3 }
 0x405   : > { %v1723_v61 = vrot.slane %v1679_v58, 1  ;;  %v1724_v62 = vrot.slane %v1679_v58, 2  ;;  %v1725_v63 = vrot.slane %v1679_v58, 3  ;;  %v1726_v1 = vrot.slane %v1679_v58, 4 }
 0x406   : > { %v1727_v2 = vrot.slane %v1679_v58, 5  ;;  %v1728_v4 = vrot.slane %v1679_v58, 6  ;;  %v1729_v5 = vrot.slane %v1679_v58, 7  ;;  %v3310_v58 = vld [vmem:[#allocation28_spill] sm:$0xff] }
 0x407   : > { %1779 = vst [vmem:[#allocation1] ss:$9 sm:$0xff] %v1723_v61  ;;  %v1540_v61 = vadd.f32 %v3310_v58, %v1122_v53  ;;  %v3320_v53 = vld [vmem:[#allocation22_spill] sm:$0xff] }
 0x408   : > { %1781 = vst [vmem:[#allocation1 + $0x1] ss:$9 sm:$0xff] %v1724_v62 }
 0x409   : > { %1783 = vst [vmem:[#allocation1 + $0x2] ss:$9 sm:$0xff] %v1725_v63 }
 0x40a   : > { %1785 = vst [vmem:[#allocation1 + $0x3] ss:$9 sm:$0xff] %v1726_v1 }
 0x40b   : > { %1787 = vst [vmem:[#allocation1 + $0x4] ss:$9 sm:$0xff] %v1727_v2 }
 0x40c   : > { %1789 = vst [vmem:[#allocation1 + $0x5] ss:$9 sm:$0xff] %v1728_v4 }
 0x40d   : > { %1791 = vst [vmem:[#allocation1 + $0x6] ss:$9 sm:$0xff] %v1729_v5 }
 0x413   : > { %v1682_v15 = vpop.f32.mrf.mxu3 }
 0x414   : > { %1793 = vst [vmem:[#allocation1 + $0x7] ss:$9 sm:$0xff] %v1682_v15  ;;  %v1730_v16 = vrot.slane %v1682_v15, 2  ;;  %v1731_v20 = vrot.slane %v1682_v15, 3  ;;  %v1732_v31 = vrot.slane %v1682_v15, 4  ;;  %v1733_v42 = vrot.slane %v1682_v15, 5 }
 0x415   : > { %v1734_v48 = vrot.slane %v1682_v15, 6  ;;  %v1735_v49 = vrot.slane %v1682_v15, 7 }
 0x41b   : > { %v1794_v27 = vld [vmem:[#allocation1] sm:$0xff] }
 0x41c   : > { %1795 = vst [vmem:[#allocation1] ss:$9 sm:$0xff] %v1730_v16  ;;  %v1866_v19 = vadd.f32 %v1794_v27, %v1537_v38 }
 0x41d   : > { %1796 = vst [vmem:[#allocation1 + $0x1] ss:$9 sm:$0xff] %v1731_v20 }
 0x41e   : > { %1797 = vst [vmem:[#allocation1 + $0x2] ss:$9 sm:$0xff] %v1732_v31  ;;  %v1894_v43 = vadd.f32 %v3085_v17, %v1866_v19  ;;  %v3311_v31 = vld [vmem:[#allocation14_spill] sm:$0xff] }
 0x41f   : > { %1798 = vst [vmem:[#allocation1 + $0x3] ss:$9 sm:$0xff] %v1733_v42 }
 0x420   : > { %1799 = vst [vmem:[#allocation1 + $0x4] ss:$9 sm:$0xff] %v1734_v48 }
 0x421   : > { %1800 = vst [vmem:[#allocation1 + $0x5] ss:$9 sm:$0xff] %v1735_v49  ;;  %v3313_v49 = vld [vmem:[#allocation29_spill] sm:$0xff] }
 0x422   : > { %v1685_v37 = vpop.f32.mrf.mxu3  ;;  %1902 = vst [vmem:[%s3093_s22] sm:$0xff] %v1894_v43 }
 0x423   : > { %v1736_v54 = vrot.slane %v1685_v37, 1  ;;  %1801 = vst [vmem:[#allocation1 + $0x6] ss:$9 sm:$0xff] %v1685_v37  ;;  %v1737_v59 = vrot.slane %v1685_v37, 3  ;;  %v1738_v9 = vrot.slane %v1685_v37, 4  ;;  %v1739_v28 = vrot.slane %v1685_v37, 5 }
 0x424   : > { %v1740_v21 = vrot.slane %v1685_v37, 6  ;;  %v1741_v30 = vrot.slane %v1685_v37, 7  ;;  %v3312_v37 = vld [vmem:[#allocation19_spill] sm:$0xff] }
 0x425   : > { %1802 = vst [vmem:[#allocation1 + $0x7] ss:$9 sm:$0xff] %v1736_v54  ;;  %v1123_v42 = vadd.f32 %v3312_v37, %v3311_v31 }
 0x427   : > { %v1541_v54 = vadd.f32 %v3313_v49, %v1123_v42 }
 0x42c   : > { %v1803_v22 = vld [vmem:[#allocation1] sm:$0xff] }
 0x42d   : > { %1804 = vst [vmem:[#allocation1] ss:$9 sm:$0xff] %v1737_v59  ;;  %v1867_v14 = vadd.f32 %v1803_v22, %v1538_v7 }
 0x42e   : > { %1805 = vst [vmem:[#allocation1 + $0x1] ss:$9 sm:$0xff] %v1738_v9 }
 0x42f   : > { %1806 = vst [vmem:[#allocation1 + $0x2] ss:$9 sm:$0xff] %v1739_v28  ;;  %v1895_v3 = vadd.f32 %v3085_v17, %v1867_v14 }
 0x430   : > { %1807 = vst [vmem:[#allocation1 + $0x3] ss:$9 sm:$0xff] %v1740_v21  ;;  %v3314_v21 = vld [vmem:[#allocation15_spill] sm:$0xff] }
 0x431   : > { %v1688_v13 = vpop.f32.mrf.mxu3  ;;  %1808 = vst [vmem:[#allocation1 + $0x4] ss:$9 sm:$0xff] %v1741_v30  ;;  %v3315_v30 = vld [vmem:[#allocation20_spill] sm:$0xff] }
 0x432   : > { %v1742_v11 = vrot.slane %v1688_v13, 1  ;;  %v1743_v10 = vrot.slane %v1688_v13, 2  ;;  %1809 = vst [vmem:[#allocation1 + $0x5] ss:$9 sm:$0xff] %v1688_v13  ;;  %v1744_v25 = vrot.slane %v1688_v13, 4  ;;  %v1745_v12 = vrot.slane %v1688_v13, 5 }
 0x433   : > { %1903 = vst [vmem:[%s3093_s22 + $0x8] sm:$0xff] %v1895_v3  ;;  %v1746_v45 = vrot.slane %v1688_v13, 6  ;;  %v1747_v46 = vrot.slane %v1688_v13, 7 }
 0x434   : > { %1810 = vst [vmem:[#allocation1 + $0x6] ss:$9 sm:$0xff] %v1742_v11  ;;  %v1124_v11 = vadd.f32 %v3315_v30, %v3314_v21 }
 0x435   : > { %1811 = vst [vmem:[#allocation1 + $0x7] ss:$9 sm:$0xff] %v1743_v10 }
 0x436   : > { %v1542_v8 = vadd.f32 %v3316_v32, %v1124_v11 }
 0x43c   : > { %v1812_v44 = vld [vmem:[#allocation1] sm:$0xff] }
 0x43d   : > { %1813 = vst [vmem:[#allocation1] ss:$9 sm:$0xff] %v1744_v25  ;;  %v1868_v34 = vadd.f32 %v1812_v44, %v1539_v50  ;;  %v1125_v44 = vadd.f32 %v3318_v40, %v3317_v35 }
 0x43e   : > { %1814 = vst [vmem:[#allocation1 + $0x1] ss:$9 sm:$0xff] %v1745_v12 }
 0x43f   : > { %1815 = vst [vmem:[#allocation1 + $0x2] ss:$9 sm:$0xff] %v1746_v45  ;;  %v1896_v33 = vadd.f32 %v3085_v17, %v1868_v34 }
 0x440   : > { %v1691_v29 = vpop.f32.mrf.mxu3  ;;  %1816 = vst [vmem:[#allocation1 + $0x3] ss:$9 sm:$0xff] %v1747_v46 }
 0x441   : > { %v1748_v47 = vrot.slane %v1691_v29, 1  ;;  %v1749_v51 = vrot.slane %v1691_v29, 2  ;;  %v1750_v36 = vrot.slane %v1691_v29, 3  ;;  %1817 = vst [vmem:[#allocation1 + $0x4] ss:$9 sm:$0xff] %v1691_v29  ;;  %v1751_v57 = vrot.slane %v1691_v29, 5 }
 0x442   : > { %1904 = vst [vmem:[%s3093_s22 + $0x10] sm:$0xff] %v1896_v33  ;;  %v1752_v62 = vrot.slane %v1691_v29, 6  ;;  %v1753_v1 = vrot.slane %v1691_v29, 7 }
 0x443   : > { %1818 = vst [vmem:[#allocation1 + $0x5] ss:$9 sm:$0xff] %v1748_v47  ;;  %v1543_v47 = vadd.f32 %v2966_v24, %v1125_v44  ;;  %v3319_v24 = vld [vmem:[#allocation17_spill] sm:$0xff] }
 0x444   : > { %1819 = vst [vmem:[#allocation1 + $0x6] ss:$9 sm:$0xff] %v1749_v51 }
 0x445   : > { %1820 = vst [vmem:[#allocation1 + $0x7] ss:$9 sm:$0xff] %v1750_v36 }
 0x44c   : > { %v1821_v63 = vld [vmem:[#allocation1] sm:$0xff] }
 0x44d   : > { %1822 = vst [vmem:[#allocation1] ss:$9 sm:$0xff] %v1751_v57  ;;  %v1869_v4 = vadd.f32 %v1821_v63, %v1540_v61 }
 0x44e   : > { %1823 = vst [vmem:[#allocation1 + $0x1] ss:$9 sm:$0xff] %v1752_v62 }
 0x44f   : > { %v1694_v56 = vpop.f32.mrf.mxu3  ;;  %1824 = vst [vmem:[#allocation1 + $0x2] ss:$9 sm:$0xff] %v1753_v1  ;;  %v1897_v20 = vadd.f32 %v3085_v17, %v1869_v4 }
 0x450   : > { %v1754_v2 = vrot.slane %v1694_v56, 1  ;;  %v1755_v5 = vrot.slane %v1694_v56, 2  ;;  %v1756_v15 = vrot.slane %v1694_v56, 3  ;;  %v1757_v16 = vrot.slane %v1694_v56, 4  ;;  %1825 = vst [vmem:[#allocation1 + $0x3] ss:$9 sm:$0xff] %v1694_v56 }
 0x451   : > { %1905 = vst [vmem:[%s3093_s22 + $0x18] sm:$0xff] %v1897_v20  ;;  %v1758_v48 = vrot.slane %v1694_v56, 6  ;;  %v1759_v60 = vrot.slane %v1694_v56, 7  ;;  %v1126_v56 = vadd.f32 %v3320_v53, %v3319_v24 }
 0x452   : > { %1826 = vst [vmem:[#allocation1 + $0x4] ss:$9 sm:$0xff] %v1754_v2 }
 0x453   : > { %1827 = vst [vmem:[#allocation1 + $0x5] ss:$9 sm:$0xff] %v1755_v5  ;;  %v1544_v57 = vadd.f32 %v2968_v18, %v1126_v56 }
 0x454   : > { %1828 = vst [vmem:[#allocation1 + $0x6] ss:$9 sm:$0xff] %v1756_v15 }
 0x455   : > { %1829 = vst [vmem:[#allocation1 + $0x7] ss:$9 sm:$0xff] %v1757_v16 }
 0x45c   : > { %v1830_v6 = vld [vmem:[#allocation1] sm:$0xff] }
 0x45d   : > { %1831 = vst [vmem:[#allocation1] ss:$9 sm:$0xff] %v1758_v48  ;;  %v1870_v38 = vadd.f32 %v1830_v6, %v1541_v54 }
 0x45e   : > { %v1697_v27 = vpop.f32.mrf.mxu3  ;;  %1832 = vst [vmem:[#allocation1 + $0x1] ss:$9 sm:$0xff] %v1759_v60 }
 0x45f   : > { %v1760_v0 = vrot.slane %v1697_v27, 1  ;;  %v1761_v59 = vrot.slane %v1697_v27, 2  ;;  %v1762_v9 = vrot.slane %v1697_v27, 3  ;;  %v1763_v13 = vrot.slane %v1697_v27, 4  ;;  %1833 = vst [vmem:[#allocation1 + $0x2] ss:$9 sm:$0xff] %v1697_v27 }
 0x460   : > { %v1764_v22 = vrot.slane %v1697_v27, 5  ;;  %v1898_v28 = vadd.f32 %v3085_v17, %v1870_v38  ;;  %v1765_v10 = vrot.slane %v1697_v27, 7 }
 0x461   : > { %1834 = vst [vmem:[#allocation1 + $0x3] ss:$9 sm:$0xff] %v1760_v0 }
 0x462   : > { %1835 = vst [vmem:[#allocation1 + $0x4] ss:$9 sm:$0xff] %v1761_v59 }
 0x463   : > { %1836 = vst [vmem:[#allocation1 + $0x5] ss:$9 sm:$0xff] %v1762_v9 }
 0x464   : > { %1837 = vst [vmem:[#allocation1 + $0x6] ss:$9 sm:$0xff] %v1763_v13 }
 0x465   : > { %1838 = vst [vmem:[#allocation1 + $0x7] ss:$9 sm:$0xff] %v1764_v22 }
 0x466   : > { %1906 = vst [vmem:[%s3093_s22 + $0x20] sm:$0xff] %v1898_v28 }
 0x46c   : > { %v1839_v26 = vld [vmem:[#allocation1] sm:$0xff] }
 0x46d   : > { %v1700_v19 = vpop.f32.mrf.mxu3  ;;  %1840 = vst [vmem:[#allocation1] ss:$9 sm:$0xff] %v1765_v10  ;;  %v1871_v14 = vadd.f32 %v1839_v26, %v1542_v8 }
 0x46e   : > { %v1766_v43 = vrot.slane %v1700_v19, 1  ;;  %v1767_v23 = vrot.slane %v1700_v19, 2  ;;  %v1768_v7 = vrot.slane %v1700_v19, 3  ;;  %v1769_v3 = vrot.slane %v1700_v19, 4  ;;  %1841 = vst [vmem:[#allocation1 + $0x1] ss:$9 sm:$0xff] %v1700_v19 }
 0x46f   : > { %v1770_v25 = vrot.slane %v1700_v19, 5  ;;  %v1771_v29 = vrot.slane %v1700_v19, 6  ;;  %v1899_v12 = vadd.f32 %v3085_v17, %v1871_v14 }
 0x470   : > { %1842 = vst [vmem:[#allocation1 + $0x2] ss:$9 sm:$0xff] %v1766_v43 }
 0x471   : > { %1843 = vst [vmem:[#allocation1 + $0x3] ss:$9 sm:$0xff] %v1767_v23 }
 0x472   : > { %1844 = vst [vmem:[#allocation1 + $0x4] ss:$9 sm:$0xff] %v1768_v7 }
 0x473   : > { %1845 = vst [vmem:[#allocation1 + $0x5] ss:$9 sm:$0xff] %v1769_v3 }
 0x474   : > { %1846 = vst [vmem:[#allocation1 + $0x6] ss:$9 sm:$0xff] %v1770_v25 }
 0x475   : > { %1847 = vst [vmem:[#allocation1 + $0x7] ss:$9 sm:$0xff] %v1771_v29 }
 0x476   : > { %1907 = vst [vmem:[%s3093_s22 + $0x28] sm:$0xff] %v1899_v12 }
 0x47c   : > { %v1703_v55 = vpop.f32.mrf.mxu3  ;;  %v1848_v50 = vld [vmem:[#allocation1] sm:$0xff] }
 0x47d   : > { %v1772_v45 = vrot.slane %v1703_v55, 1  ;;  %v1773_v46 = vrot.slane %v1703_v55, 2  ;;  %v1774_v41 = vrot.slane %v1703_v55, 3  ;;  %v1775_v51 = vrot.slane %v1703_v55, 4  ;;  %1849 = vst [vmem:[#allocation1] ss:$9 sm:$0xff] %v1703_v55 }
 0x47e   : > { %v1872_v36 = vadd.f32 %v1848_v50, %v1543_v47  ;;  %v1776_v34 = vrot.slane %v1703_v55, 5  ;;  %v1777_v33 = vrot.slane %v1703_v55, 6  ;;  %v1778_v39 = vrot.slane %v1703_v55, 7 }
 0x47f   : > { %1850 = vst [vmem:[#allocation1 + $0x1] ss:$9 sm:$0xff] %v1772_v45 }
 0x480   : > { %1851 = vst [vmem:[#allocation1 + $0x2] ss:$9 sm:$0xff] %v1773_v46  ;;  %v1900_v52 = vadd.f32 %v3085_v17, %v1872_v36 }
 0x481   : > { %1852 = vst [vmem:[#allocation1 + $0x3] ss:$9 sm:$0xff] %v1774_v41 }
 0x482   : > { %1853 = vst [vmem:[#allocation1 + $0x4] ss:$9 sm:$0xff] %v1775_v51 }
 0x483   : > { %1854 = vst [vmem:[#allocation1 + $0x5] ss:$9 sm:$0xff] %v1776_v34 }
 0x484   : > { %1855 = vst [vmem:[#allocation1 + $0x6] ss:$9 sm:$0xff] %v1777_v33 }
 0x485   : > { %1856 = vst [vmem:[#allocation1 + $0x7] ss:$9 sm:$0xff] %v1778_v39 }
 0x486   : > { %1908 = vst [vmem:[%s3093_s22 + $0x30] sm:$0xff] %v1900_v52 }
 0x48c   : > { %v1857_v58 = vld [vmem:[#allocation1] sm:$0xff] }
 0x48d   : > { %v1873_v61 = vadd.f32 %v1857_v58, %v1544_v57 }
 0x48f   : > { %v1901_v62 = vadd.f32 %v3085_v17, %v1873_v61 }
 0x491   : > { %1909 = vst [vmem:[%s3093_s22 + $0x38] sm:$0xff] %v1901_v62 }
 0x492   : > { %2211 = shalt.err (!%p2208_p5)
}
 0x493   : > { %s2264_s12 = smov 128   ;;  %s2265_s21 = smov 8  }
 0x494   : > { %2125 = dma.vmem_to_hbm [thread:$0]  (%p2331_p4), %s1927_s5, 1024, %s1929_s6, %s1911_s18, %s2264_s12, %s2264_s12, %s2265_s21  }
 0x495 PF: > { %p2132_p6 = scmp.ge.s32.totalorder %s2262_s20, 2  ;;  %s1943_s22 = sand.u32 1, %s2242_s15  }
 0x496   : > { %s1944_s24 = scalar_lea.sflag [#allocation5], %s1943_s22 }
 0x497   : > { %p2128_p7 = pnand %p2132_p6, %p2338_p8 }
 0x499   : > { %p2129_p9 = pneg %p2128_p7 }
 0x49b   : > { %2237 = dma.done.wait (%p2129_p9), %s1944_s24, 1024  }
 0x49c   : > { %2239 = vsyncadd (%p2129_p9), %s1944_s24, 4294966272  ;;  %s17_s20 = sadd.s32 1, %s2262_s20   ;;  %s3321_s15 = smov %s2246_s16 }
 0x49d   : > { %p14_p10 = scmp.ge.s32.totalorder %s17_s20, 4   ;;  %s3322_s16 = smov %s2250_s17 }
 0x49e   : > { %s3323_s17 = smov %s2344_s28  ;;  %s3324_s18 = smov %s2258_s19 }
 0x49f   : > { %s3325_s19 = smov %s3327_s23  ;;  %16 = sbr.rel (!%p14_p10) target bundleno = 4 (0x4), region = 141 }
 0x4a4   :  { %1950 = vsyncpa [#allocation5], 1 }
 0x4a5   :  { %1952 = vsyncpa [#allocation5 + $0x1], 1 }

</bundles_post_ra>
